<compile_context>
chip_gen: v7x
topology: tpu7x:2x2x1
jax: 0.10.0
libtpu: 0.0.40
codegen_flags: <defaults>
</compile_context>

<pallas_src>
import jax
import jax.numpy as jnp
from jax import lax
from jax.experimental import pallas as pl
from jax.experimental.pallas import tpu as pltpu


def _round_up(x, m):
    return (x + m - 1) // m * m


def _cdiv(a, b):
    return (a + b - 1) // b


def tones_generator_kernel(
    x_ref,        # (Bt, 1)        int32   VMEM  (hidden-state indices, clamped < H)
    y_ref,        # (Bt, D)        f32     VMEM
    convM_ref,    # (D, H + C*D)   f32/bf16 VMEM (host-precomputed conv matrix)
    bconv_ref,    # (1, H + C*D)   f32     VMEM  (conv bias, zero in first H lanes)
    wh_ref,       # (H + C*D, N)   f32/bf16 VMEM ([x_to_hidden.W.T ; y_to_hidden.W.T])
    bh_ref,       # (1, N)         f32     VMEM  (bx + by folded)
    wlT_ref,      # (N, D)         f32/bf16 VMEM (hidden_to_logits.W.T)
    bl_ref,       # (1, D)         f32     VMEM
    out_ref,      # (Bt, D)        f32     VMEM
):
    dot_dtype = convM_ref.dtype                  # f32 or bf16 (MXU operand dtype)
    x = x_ref[...]                               # (Bt, 1) int32
    y = y_ref[...]                               # (Bt, D) f32
    bt = y.shape[0]
    feat_dim = convM_ref.shape[1]                # H + C*D (static)

    # Conv1d(1, C, 3, pad=1), all channels in ONE MXU op; results land in lanes
    # [H, H+C*D); lanes [0, H) stay exactly 0 after ReLU (zero cols, zero bias).
    conv = jnp.dot(y.astype(dot_dtype), convM_ref[...],
                   preferred_element_type=jnp.float32)
    conv = jnp.maximum(conv + bconv_ref[...], 0.0)            # (Bt, F) f32

    # one_hot(x, H) occupies lanes [0, H) only (x clamped < H in the wrapper),
    # so a single VPU add yields [one_hot | relu(conv)] without a lane concat.
    lane = lax.broadcasted_iota(jnp.int32, (bt, feat_dim), 1)
    feat = conv + (lane == x).astype(jnp.float32)             # (Bt, F) f32

    # Fused hidden projection: relu(one_hot @ WxT + relu(conv) @ WyT + bx + by).
    h = jnp.dot(feat.astype(dot_dtype), wh_ref[...],
                preferred_element_type=jnp.float32)
    h = jnp.maximum(h + bh_ref[...], 0.0)                     # (Bt, N) f32

    logits = jnp.dot(h.astype(dot_dtype), wlT_ref[...],
                     preferred_element_type=jnp.float32)
    out_ref[...] = (logits + bl_ref[...]).astype(out_ref.dtype)


def pack_params(params, *, nn_channels, hidden_dim, data_dim,
                dot_dtype=jnp.float32):
    """Host-side repacking of PyTorch-shaped (pre-transposed) parameters.

    dot_dtype: dtype of the MXU weight operands (use jnp.bfloat16 on v6e/v7x
    for the fast MXU path; accumulation and all VPU math stay f32).
    """
    C, D, H = nn_channels, data_dim, hidden_dim
    f32 = jnp.float32

    # Shift matrices: (y @ up)[d] = y[d-1], (y @ dn)[d] = y[d+1] (zero padded).
    eye = jnp.eye(D, dtype=f32)
    up = jnp.eye(D, k=1, dtype=f32)
    dn = jnp.eye(D, k=-1, dtype=f32)
    blocks = [
        params["wconv"][c, 0] * up
        + params["wconv"][c, 1] * eye
        + params["wconv"][c, 2] * dn
        for c in range(C)
    ]
    convM = jnp.concatenate([jnp.zeros((D, H), f32)] + blocks, axis=1)  # (D, H+C*D)
    bconv = jnp.concatenate(
        [jnp.zeros((H,), f32), jnp.repeat(params["bconv"].astype(f32), D)]
    )[None, :]                                                           # (1, H+C*D)

    wh = jnp.concatenate([params["wxT"], params["wyT"]], axis=0)         # (H+C*D, N)
    bh = params["bx"] + params["by"]                                     # (1, N)

    return {
        "convM": convM.astype(dot_dtype), "bconv": bconv,
        "wh": wh.astype(dot_dtype), "bh": bh,
        "wlT": params["wlT"].astype(dot_dtype), "bl": params["bl"],
    }


def tones_generator_forward(x, y, packed, *, hidden_dim, data_dim,
                            batch_tile=1024, min_grid_steps=2):
    """Contract: flatten all HMM timesteps x minibatch rows into B before calling."""
    B, D = y.shape
    assert D == data_dim
    F = packed["convM"].shape[1]
    N = packed["wh"].shape[1]

    # Clamp indices so an out-of-range x can never touch the conv lane region.
    x = jnp.clip(x.astype(jnp.int32), 0, hidden_dim - 1)

    # Batch tile: multiple of 8 sublanes, as large as possible (kernel is
    # fixed-overhead / DMA-bound), but keep >= min_grid_steps grid steps so the
    # "parallel" batch axis can shard across both TensorCores on v7x.
    bt = batch_tile
    if min_grid_steps > 1 and B > 8:
        bt = min(bt, _round_up(_cdiv(B, min_grid_steps), 8))
    bt = _round_up(min(bt, _round_up(B, 8)), 8)
    b_pad = _round_up(B, bt)
    if b_pad != B:
        x = jnp.pad(x, ((0, b_pad - B), (0, 0)))   # padded rows sliced off below
        y = jnp.pad(y, ((0, b_pad - B), (0, 0)))
    grid = (b_pad // bt,)

    out = pl.pallas_call(
        tones_generator_kernel,
        out_shape=jax.ShapeDtypeStruct((b_pad, D), jnp.float32),
        grid_spec=pltpu.PrefetchScalarGridSpec(
            num_scalar_prefetch=0,
            grid=grid,
            in_specs=[
                pl.BlockSpec((bt, 1), lambda i: (i, 0)),     # x indices
                pl.BlockSpec((bt, D), lambda i: (i, 0)),     # y
                pl.BlockSpec((D, F), lambda i: (0, 0)),      # convM (resident)
                pl.BlockSpec((1, F), lambda i: (0, 0)),      # bconv
                pl.BlockSpec((F, N), lambda i: (0, 0)),      # wh
                pl.BlockSpec((1, N), lambda i: (0, 0)),      # bh
                pl.BlockSpec((N, D), lambda i: (0, 0)),      # wlT
                pl.BlockSpec((1, D), lambda i: (0, 0)),      # bl
            ],
            out_specs=pl.BlockSpec((bt, D), lambda i: (i, 0)),
        ),
        compiler_params=pltpu.CompilerParams(
            dimension_semantics=("parallel",)),   # both TCs on v7x; harmless elsewhere
    )(x, y, packed["convM"], packed["bconv"], packed["wh"], packed["bh"],
      packed["wlT"], packed["bl"])
    return out if b_pad == B else out[:B]


def reference_forward(x, y, params, *, nn_channels, hidden_dim):
    """Pure-JAX replica of the PyTorch forward for validation (raw f32 params)."""
    B, D = y.shape
    onehot = jax.nn.one_hot(x[:, 0], hidden_dim, dtype=jnp.float32)
    ypad = jnp.pad(y, ((0, 0), (1, 1)))
    conv = jnp.stack(
        [
            sum(params["wconv"][c, k] * ypad[:, k:k + D] for k in range(3))
            + params["bconv"][c]
            for c in range(nn_channels)
        ],
        axis=1,
    )                                                        # (B, C, D)
    y_conv = jax.nn.relu(conv).reshape(B, nn_channels * D)   # channel-major flatten
    h = jax.nn.relu(onehot @ params["wxT"] + params["bx"]
                    + y_conv @ params["wyT"] + params["by"])
    return h @ params["wlT"] + params["bl"]


def packed_forward_jax(x, y, packed):
    """Pure-JAX replica of the KERNEL math (same packed weights / dot dtypes).

    Used to validate the bf16-MXU-operand path with a tight tolerance: it
    differs from the kernel only by f32 accumulation order.
    """
    dd = packed["convM"].dtype
    conv = jnp.dot(y.astype(dd), packed["convM"], preferred_element_type=jnp.float32)
    conv = jnp.maximum(conv + packed["bconv"], 0.0)
    feat_dim = packed["convM"].shape[1]
    onehot = (jnp.arange(feat_dim, dtype=jnp.int32)[None, :] == x).astype(jnp.float32)
    feat = conv + onehot
    h = jnp.dot(feat.astype(dd), packed["wh"], preferred_element_type=jnp.float32)
    h = jnp.maximum(h + packed["bh"], 0.0)
    logits = jnp.dot(h.astype(dd), packed["wlT"], preferred_element_type=jnp.float32)
    return logits + packed["bl"]


if __name__ == "__main__":
    # Module-consistent small dims. B represents all HMM timesteps x minibatch
    # rows flattened into ONE pallas_call (the contract); with batch_tile=1024
    # and min_grid_steps=2 this yields 2 grid steps of 512 rows.
    B = 1024         # flattened time x batch
    hidden_dim = 16  # args.hidden_dim (one-hot size for x)
    nn_dim = 32      # args.nn_dim
    nn_channels = 2  # args.nn_channels
    data_dim = 16    # data_dim (tone vector length)

    key = jax.random.PRNGKey(0)
    keys = jax.random.split(key, 10)

    # Deterministic synthetic parameters (PyTorch shapes, Linear weights pre-transposed).
    params = {
        "wconv": 0.3 * jax.random.normal(keys[0], (nn_channels, 3), jnp.float32),
        "bconv": 0.1 * jax.random.normal(keys[1], (nn_channels,), jnp.float32),
        # x_to_hidden: Linear(hidden_dim, nn_dim) -> pass W.T (hidden_dim, nn_dim)
        "wxT": 0.2 * jax.random.normal(keys[2], (hidden_dim, nn_dim), jnp.float32),
        "bx": 0.1 * jax.random.normal(keys[3], (1, nn_dim), jnp.float32),
        # y_to_hidden: Linear(nn_channels*data_dim, nn_dim) -> pass W.T
        "wyT": 0.2 * jax.random.normal(
            keys[4], (nn_channels * data_dim, nn_dim), jnp.float32),
        "by": 0.1 * jax.random.normal(keys[5], (1, nn_dim), jnp.float32),
        # hidden_to_logits: Linear(nn_dim, data_dim) -> pass W.T
        "wlT": 0.2 * jax.random.normal(keys[6], (nn_dim, data_dim), jnp.float32),
        "bl": 0.1 * jax.random.normal(keys[7], (1, data_dim), jnp.float32),
    }

    # Inputs: x is an index tensor (B, 1) into hidden_dim; y is (B, data_dim).
    x = jax.random.randint(keys[8], (B, 1), 0, hidden_dim, dtype=jnp.int32)
    y = jax.random.normal(keys[9], (B, data_dim), jnp.float32)

    ref = reference_forward(
        x, y, params, nn_channels=nn_channels, hidden_dim=hidden_dim)

    # ---- f32 MXU path: exact semantic check against the PyTorch-faithful ref ----
    packed32 = pack_params(params, nn_channels=nn_channels, hidden_dim=hidden_dim,
                           data_dim=data_dim, dot_dtype=jnp.float32)
    out32 = tones_generator_forward(
        x, y, packed32, hidden_dim=hidden_dim, data_dim=data_dim)
    out32 = jax.block_until_ready(out32)
    assert out32.shape == (B, data_dim)
    assert jnp.allclose(out32, ref, atol=1e-4, rtol=1e-4), "f32 mismatch vs reference"

    # ---- bf16-MXU-operand path (fast path on v6e/v7x; f32 accumulation) ----
    packed16 = pack_params(params, nn_channels=nn_channels, hidden_dim=hidden_dim,
                           data_dim=data_dim, dot_dtype=jnp.bfloat16)
    out16 = tones_generator_forward(
        x, y, packed16, hidden_dim=hidden_dim, data_dim=data_dim)
    out16 = jax.block_until_ready(out16)
    ref16 = packed_forward_jax(x, y, packed16)   # dtype-matched JAX replica
    assert out16.shape == (B, data_dim)
    assert jnp.allclose(out16, ref16, atol=5e-3, rtol=5e-3), "bf16 mismatch vs replica"

    print("KERNEL_OK")
</pallas_src>

<mosaic_0001>
module attributes {stable_mosaic.version = 11 : i64} {
  func.func @tones_generator_kernel(%arg0: i32, %arg1: memref<512x1xi32, #tpu.memory_space<vmem>>, %arg2: memref<512x16xf32, #tpu.memory_space<vmem>>, %arg3: memref<16x48xf32, #tpu.memory_space<vmem>>, %arg4: memref<1x48xf32, #tpu.memory_space<vmem>>, %arg5: memref<48x32xf32, #tpu.memory_space<vmem>>, %arg6: memref<1x32xf32, #tpu.memory_space<vmem>>, %arg7: memref<32x16xf32, #tpu.memory_space<vmem>>, %arg8: memref<1x16xf32, #tpu.memory_space<vmem>>, %arg9: memref<512x16xf32, #tpu.memory_space<vmem>>) attributes {dimension_semantics = [#tpu.dimension_semantics<parallel>], iteration_bounds = array<i64: 2>, scalar_prefetch = 0 : i64, scratch_operands = 0 : i64, tpu.core_type = #tpu.core_type<tc>, window_params = [{transform_indices = @transform_0, window_bounds = array<i64: 512, 1>}, {transform_indices = @transform_1, window_bounds = array<i64: 512, 16>}, {pipeline_mode = #tpu.pipeline_mode<synchronous>, transform_indices = @transform_2, window_bounds = array<i64: 16, 48>}, {pipeline_mode = #tpu.pipeline_mode<synchronous>, transform_indices = @transform_3, window_bounds = array<i64: 1, 48>}, {pipeline_mode = #tpu.pipeline_mode<synchronous>, transform_indices = @transform_4, window_bounds = array<i64: 48, 32>}, {pipeline_mode = #tpu.pipeline_mode<synchronous>, transform_indices = @transform_5, window_bounds = array<i64: 1, 32>}, {pipeline_mode = #tpu.pipeline_mode<synchronous>, transform_indices = @transform_6, window_bounds = array<i64: 32, 16>}, {pipeline_mode = #tpu.pipeline_mode<synchronous>, transform_indices = @transform_7, window_bounds = array<i64: 1, 16>}, {transform_indices = @transform_8, window_bounds = array<i64: 512, 16>}]} {
    %c0 = arith.constant 0 : index
    %c0_0 = arith.constant 0 : index
    %0 = vector.load %arg1[%c0, %c0_0] : memref<512x1xi32, #tpu.memory_space<vmem>>, vector<512x1xi32>
    %c0_1 = arith.constant 0 : index
    %c0_2 = arith.constant 0 : index
    %1 = vector.load %arg2[%c0_1, %c0_2] : memref<512x16xf32, #tpu.memory_space<vmem>>, vector<512x16xf32>
    %c0_3 = arith.constant 0 : index
    %c0_4 = arith.constant 0 : index
    %2 = vector.load %arg3[%c0_3, %c0_4] : memref<16x48xf32, #tpu.memory_space<vmem>>, vector<16x48xf32>
    %cst = arith.constant dense<0.000000e+00> : vector<512x48xf32>
    %3 = tpu.matmul %1, %2, %cst {dimension_numbers = #tpu.dot_dimension_numbers<[1], [0], [0], [1], [0, 0, 1, 1], [], []>} : vector<512x16xf32>, vector<16x48xf32>, vector<512x48xf32> -> vector<512x48xf32>
    %c0_5 = arith.constant 0 : index
    %c0_6 = arith.constant 0 : index
    %4 = vector.load %arg4[%c0_5, %c0_6] : memref<1x48xf32, #tpu.memory_space<vmem>>, vector<1x48xf32>
    %5 = vector.broadcast %4 : vector<1x48xf32> to vector<512x48xf32>
    %6 = arith.addf %3, %5 : vector<512x48xf32>
    %cst_7 = arith.constant 0.000000e+00 : f32
    %7 = vector.broadcast %cst_7 : f32 to vector<512x48xf32>
    %8 = arith.maximumf %6, %7 : vector<512x48xf32>
    %9 = tpu.iota {dimensions = array<i32: 1>} : vector<512x48xi32>
    %10 = vector.broadcast %0 : vector<512x1xi32> to vector<512x48xi32>
    %11 = arith.cmpi eq, %9, %10 : vector<512x48xi32>
    %12 = arith.extui %11 : vector<512x48xi1> to vector<512x48xi32>
    %13 = arith.sitofp %12 : vector<512x48xi32> to vector<512x48xf32>
    %14 = arith.addf %8, %13 : vector<512x48xf32>
    %c0_8 = arith.constant 0 : index
    %c0_9 = arith.constant 0 : index
    %15 = vector.load %arg5[%c0_8, %c0_9] : memref<48x32xf32, #tpu.memory_space<vmem>>, vector<48x32xf32>
    %cst_10 = arith.constant dense<0.000000e+00> : vector<512x32xf32>
    %16 = tpu.matmul %14, %15, %cst_10 {dimension_numbers = #tpu.dot_dimension_numbers<[1], [0], [0], [1], [0, 0, 1, 1], [], []>} : vector<512x48xf32>, vector<48x32xf32>, vector<512x32xf32> -> vector<512x32xf32>
    %c0_11 = arith.constant 0 : index
    %c0_12 = arith.constant 0 : index
    %17 = vector.load %arg6[%c0_11, %c0_12] : memref<1x32xf32, #tpu.memory_space<vmem>>, vector<1x32xf32>
    %18 = vector.broadcast %17 : vector<1x32xf32> to vector<512x32xf32>
    %19 = arith.addf %16, %18 : vector<512x32xf32>
    %cst_13 = arith.constant 0.000000e+00 : f32
    %20 = vector.broadcast %cst_13 : f32 to vector<512x32xf32>
    %21 = arith.maximumf %19, %20 : vector<512x32xf32>
    %c0_14 = arith.constant 0 : index
    %c0_15 = arith.constant 0 : index
    %22 = vector.load %arg7[%c0_14, %c0_15] : memref<32x16xf32, #tpu.memory_space<vmem>>, vector<32x16xf32>
    %cst_16 = arith.constant dense<0.000000e+00> : vector<512x16xf32>
    %23 = tpu.matmul %21, %22, %cst_16 {dimension_numbers = #tpu.dot_dimension_numbers<[1], [0], [0], [1], [0, 0, 1, 1], [], []>} : vector<512x32xf32>, vector<32x16xf32>, vector<512x16xf32> -> vector<512x16xf32>
    %c0_17 = arith.constant 0 : index
    %c0_18 = arith.constant 0 : index
    %24 = vector.load %arg8[%c0_17, %c0_18] : memref<1x16xf32, #tpu.memory_space<vmem>>, vector<1x16xf32>
    %25 = vector.broadcast %24 : vector<1x16xf32> to vector<512x16xf32>
    %26 = arith.addf %23, %25 : vector<512x16xf32>
    %c0_19 = arith.constant 0 : index
    %c0_20 = arith.constant 0 : index
    %27 = vector.load %arg9[%c0_19, %c0_20] : memref<512x16xf32, #tpu.memory_space<vmem>>, vector<512x16xf32>
    tpu.vector_store %arg9[%c0_19, %c0_20], %26 {strides = array<i32>} : memref<512x16xf32, #tpu.memory_space<vmem>>, vector<512x16xf32>,
    return
  }
  func.func @transform_0(%arg0: i32) -> (i32, i32) {
    %c0_i32 = arith.constant 0 : i32
    %c0_i32_0 = arith.constant 0 : i32
    return %arg0, %c0_i32 : i32, i32
  }
  func.func @transform_1(%arg0: i32) -> (i32, i32) {
    %c0_i32 = arith.constant 0 : i32
    %c0_i32_0 = arith.constant 0 : i32
    return %arg0, %c0_i32 : i32, i32
  }
  func.func @transform_2(%arg0: i32) -> (i32, i32) {
    %c0_i32 = arith.constant 0 : i32
    %c0_i32_0 = arith.constant 0 : i32
    %c0_i32_1 = arith.constant 0 : i32
    return %c0_i32, %c0_i32_0 : i32, i32
  }
  func.func @transform_3(%arg0: i32) -> (i32, i32) {
    %c0_i32 = arith.constant 0 : i32
    %c0_i32_0 = arith.constant 0 : i32
    %c0_i32_1 = arith.constant 0 : i32
    return %c0_i32, %c0_i32_0 : i32, i32
  }
  func.func @transform_4(%arg0: i32) -> (i32, i32) {
    %c0_i32 = arith.constant 0 : i32
    %c0_i32_0 = arith.constant 0 : i32
    %c0_i32_1 = arith.constant 0 : i32
    return %c0_i32, %c0_i32_0 : i32, i32
  }
  func.func @transform_5(%arg0: i32) -> (i32, i32) {
    %c0_i32 = arith.constant 0 : i32
    %c0_i32_0 = arith.constant 0 : i32
    %c0_i32_1 = arith.constant 0 : i32
    return %c0_i32, %c0_i32_0 : i32, i32
  }
  func.func @transform_6(%arg0: i32) -> (i32, i32) {
    %c0_i32 = arith.constant 0 : i32
    %c0_i32_0 = arith.constant 0 : i32
    %c0_i32_1 = arith.constant 0 : i32
    return %c0_i32, %c0_i32_0 : i32, i32
  }
  func.func @transform_7(%arg0: i32) -> (i32, i32) {
    %c0_i32 = arith.constant 0 : i32
    %c0_i32_0 = arith.constant 0 : i32
    %c0_i32_1 = arith.constant 0 : i32
    return %c0_i32, %c0_i32_0 : i32, i32
  }
  func.func @transform_8(%arg0: i32) -> (i32, i32) {
    %c0_i32 = arith.constant 0 : i32
    %c0_i32_0 = arith.constant 0 : i32
    return %arg0, %c0_i32 : i32, i32
  }
}

</mosaic_0001>

<bundles_post_ra>
// kernel: tpu_custom_call.1
= control target key start
LH: loop header
LB: loop body
LE: loop exit
PB: predicated region body
PF: predicated region fallthrough
CT: control target
= control target key end

     0   :  { %s3817_s27 = smov 0   ;;  %s4930_s0 = inlined_call_operand.vmem [shape: s32[1024,1], index: 0, kind: input, shape index: {}]   ;;  %s4931_s1 = inlined_call_operand.vmem [shape: f32[1024,16], index: 1, kind: input, shape index: {}]   ;;  %s4932_s2 = inlined_call_operand.vmem [shape: f32[16,48], index: 2, kind: input, shape index: {}]   ;;  %s4933_s3 = inlined_call_operand.vmem [shape: f32[1,48], index: 3, kind: input, shape index: {}]   ;;  %s4934_s4 = inlined_call_operand.vmem [shape: f32[48,32], index: 4, kind: input, shape index: {}]   ;;  %s4935_s5 = inlined_call_operand.vmem [shape: f32[1,32], index: 5, kind: input, shape index: {}]   ;;  %s4936_s6 = inlined_call_operand.vmem [shape: f32[32,16], index: 6, kind: input, shape index: {}]   ;;  %s4937_s7 = inlined_call_operand.vmem [shape: f32[1,16], index: 7, kind: input, shape index: {}]   ;;  %s4938_s8 = inlined_call_operand.vmem [shape: f32[1024,16], index: 8, kind: output, shape index: {}]  }
   0x1 LB: > { %s2936_s28 = sadd.s32 4294967295, %s3768_s27   ;;  %p2940_p0 = scmp.ge.s32.totalorder %s3768_s27, 1  ;;  %s3768_s27 = sphi %s3817_s27, %s18_s27  }
   0x2   : > { %p274_p1 = scmp.lt.s32.totalorder %s3768_s27, 3 }
   0x4   : > { %p275_p2 = pnand %p2940_p0, %p274_p1 }
   0x5   : > { %v459_v0 = vld [vmem:[%s4932_s2] sm:$0xff] (!%p275_p2)  ;;  %v460_v1 = vld [vmem:[%s4932_s2 + $0x8] sm:$0xff] (!%p275_p2)  ;;  %s2941_s11 = sshll.u32 (!%p275_p2), %s2936_s28, 6  ;;  %v3770_v3 = vmov (!%p275_p2), 0   ;;  %vm468_vm0 = vcmask (!%p275_p2), 130048   ;;  %vm1573_vm5 = vcmask (!%p275_p2), 392192  }
   0x6   : > { %278 = sbr.rel (%p275_p2) target bundleno = 796 (0x31c), region = 52  ;;  %v3724_v2 = vpack.c.bf16 (!%p275_p2), %v460_v1, %v459_v0  ;;  %3761 = vset.pattern.permute.xlu1 (!%p275_p2), %v3770_v3  ;;  %3760 = vset.pattern.permute.xlu0 (!%p275_p2), %v3770_v3  ;;  %p314_p3 = scmp.lt.s32.totalorder (!%p275_p2), %s2941_s11, 127 }
   0x8   : > { %3725 = vmatprep.subr.bf16.mxu0 (!%p275_p2), %v3724_v2  ;;  %3748 = vmatprep.subr.bf16.mxu1 (!%p275_p2), %v3724_v2 }
   0x9   : > { %3727 = vmatpush3.bf16.msra.mxu0 (!%p275_p2), %v3724_v2  ;;  %3749 = vmatpush3.bf16.msra.mxu1 (!%p275_p2), %v3724_v2 }
   0xd   : > { %s4940_s11 = smov (!%p314_p3, %s2941_s11), 127 }
   0xe   : > { %s3831_s12 = sshll.u32 %s4940_s11, 3 }
   0xf   : > { %s3837_s15 = scalar_lea.vmem %s4931_s1, %s3831_s12  ;;  %s3843_s18 = scalar_lea.vmem %s4930_s0, %s3831_s12 }
  0x10   : > { %v395_v4 = vld [vmem:[%s3837_s15] sm:$0xff]  ;;  %v333_v6 = vld [vmem:[%s3843_s18 + $0x10] sm:$0xff]  ;;  %v396_v8 = vld [vmem:[%s3837_s15 + $0x8] sm:$0xff]  ;;  %s4733_s28 = scalar_lea.vmem %s4938_s8, %s3831_s12 }
  0x11   : > { %v427_v5 = vld [vmem:[%s3837_s15 + $0x100] sm:$0xff]  ;;  %3416 = vmatprep.mubr.msk.f32.mxu0 %vm468_vm0, %v395_v4  ;;  %v428_v9 = vld [vmem:[%s3837_s15 + $0x108] sm:$0xff]  ;;  %1119 = vperm.xlu1 %3761, %v333_v6   ;;  %v397_v10 = vld [vmem:[%s3837_s15 + $0x10] sm:$0xff] }
  0x12   : > { %3464 = vmatprep.mubr.msk.f32.mxu1 %vm468_vm0, %v427_v5  ;;  %v331_v7 = vld [vmem:[%s3843_s18] sm:$0xff]  ;;  %v429_v11 = vld [vmem:[%s3837_s15 + $0x110] sm:$0xff]  ;;  %3417 = vmatmul.mubr.msk.f32.vlgmr.msra.gmra.mrb[0].mxu0 %vm468_vm0, %v396_v8  ;;  %v334_v12 = vld [vmem:[%s3843_s18 + $0x18] sm:$0xff] }
  0x13   : > { %1113 = vperm.xlu0 %3760, %v331_v7   ;;  %3465 = vmatmul.mubr.msk.f32.vlgmr.msra.gmra.mrb[0].mxu1 %vm468_vm0, %v428_v9  ;;  %v332_v13 = vld [vmem:[%s3843_s18 + $0x8] sm:$0xff]  ;;  %v398_v14 = vld [vmem:[%s3837_s15 + $0x18] sm:$0xff]  ;;  %v399_v16 = vld [vmem:[%s3837_s15 + $0x20] sm:$0xff] }
  0x14   : > { %3419 = vmatprep.mubr.msk.f32.mxu0 %vm468_vm0, %v397_v10  ;;  %3467 = vmatprep.mubr.msk.f32.mxu1 %vm468_vm0, %v429_v11  ;;  %v430_v15 = vld [vmem:[%s3837_s15 + $0x118] sm:$0xff]  ;;  %v431_v17 = vld [vmem:[%s3837_s15 + $0x120] sm:$0xff]  ;;  %v336_v18 = vld [vmem:[%s3843_s18 + $0x28] sm:$0xff] }
  0x15   : > { %1122 = vperm.xlu1 %3761, %v334_v12   ;;  %v335_v19 = vld [vmem:[%s3843_s18 + $0x20] sm:$0xff]  ;;  %v400_v20 = vld [vmem:[%s3837_s15 + $0x28] sm:$0xff]  ;;  %v401_v22 = vld [vmem:[%s3837_s15 + $0x30] sm:$0xff] }
  0x16   : > { %3420 = vmatmul.mubr.msk.f32.gmra.mrb[2].mxu0 %vm468_vm0, %v398_v14  ;;  %v432_v21 = vld [vmem:[%s3837_s15 + $0x128] sm:$0xff]  ;;  %v433_v23 = vld [vmem:[%s3837_s15 + $0x130] sm:$0xff]  ;;  %v338_v24 = vld [vmem:[%s3843_s18 + $0x38] sm:$0xff] }
  0x17   : > { %1116 = vperm.xlu0 %3760, %v332_v13   ;;  %3468 = vmatmul.mubr.msk.f32.gmra.mrb[2].mxu1 %vm468_vm0, %v430_v15  ;;  %v337_v25 = vld [vmem:[%s3843_s18 + $0x30] sm:$0xff]  ;;  %v402_v26 = vld [vmem:[%s3837_s15 + $0x38] sm:$0xff]  ;;  %v403_v28 = vld [vmem:[%s3837_s15 + $0x40] sm:$0xff] }
  0x18   : > { %3422 = vmatprep.mubr.msk.f32.mxu0 %vm468_vm0, %v399_v16  ;;  %3470 = vmatprep.mubr.msk.f32.mxu1 %vm468_vm0, %v431_v17  ;;  %v434_v27 = vld [vmem:[%s3837_s15 + $0x138] sm:$0xff]  ;;  %v435_v29 = vld [vmem:[%s3837_s15 + $0x140] sm:$0xff]  ;;  %v340_v30 = vld [vmem:[%s3843_s18 + $0x48] sm:$0xff] }
  0x19   : > { %1128 = vperm.xlu1 %3761, %v336_v18   ;;  %v339_v31 = vld [vmem:[%s3843_s18 + $0x40] sm:$0xff]  ;;  %v404_v32 = vld [vmem:[%s3837_s15 + $0x48] sm:$0xff]  ;;  %v405_v34 = vld [vmem:[%s3837_s15 + $0x50] sm:$0xff] }
  0x1a   : > { %3423 = vmatmul.mubr.msk.f32.gmra.mrb[4].mxu0 %vm468_vm0, %v400_v20  ;;  %v436_v33 = vld [vmem:[%s3837_s15 + $0x148] sm:$0xff]  ;;  %v437_v35 = vld [vmem:[%s3837_s15 + $0x150] sm:$0xff]  ;;  %v342_v36 = vld [vmem:[%s3843_s18 + $0x58] sm:$0xff] }
  0x1b   : > { %1125 = vperm.xlu0 %3760, %v335_v19   ;;  %3471 = vmatmul.mubr.msk.f32.gmra.mrb[4].mxu1 %vm468_vm0, %v432_v21  ;;  %v341_v37 = vld [vmem:[%s3843_s18 + $0x50] sm:$0xff]  ;;  %v406_v38 = vld [vmem:[%s3837_s15 + $0x58] sm:$0xff]  ;;  %v407_v40 = vld [vmem:[%s3837_s15 + $0x60] sm:$0xff] }
  0x1c   : > { %3425 = vmatprep.mubr.msk.f32.mxu0 %vm468_vm0, %v401_v22  ;;  %3473 = vmatprep.mubr.msk.f32.mxu1 %vm468_vm0, %v433_v23  ;;  %v438_v39 = vld [vmem:[%s3837_s15 + $0x158] sm:$0xff]  ;;  %v439_v41 = vld [vmem:[%s3837_s15 + $0x160] sm:$0xff]  ;;  %v344_v42 = vld [vmem:[%s3843_s18 + $0x68] sm:$0xff] }
  0x1d   : > { %1134 = vperm.xlu1 %3761, %v338_v24   ;;  %v343_v43 = vld [vmem:[%s3843_s18 + $0x60] sm:$0xff]  ;;  %v408_v44 = vld [vmem:[%s3837_s15 + $0x68] sm:$0xff]  ;;  %v409_v46 = vld [vmem:[%s3837_s15 + $0x70] sm:$0xff] }
  0x1e   : > { %3426 = vmatmul.mubr.msk.f32.gmra.mrb[6].mxu0 %vm468_vm0, %v402_v26  ;;  %v440_v45 = vld [vmem:[%s3837_s15 + $0x168] sm:$0xff]  ;;  %v441_v47 = vld [vmem:[%s3837_s15 + $0x170] sm:$0xff]  ;;  %v346_v48 = vld [vmem:[%s3843_s18 + $0x78] sm:$0xff] }
  0x1f   : > { %1131 = vperm.xlu0 %3760, %v337_v25   ;;  %3474 = vmatmul.mubr.msk.f32.gmra.mrb[6].mxu1 %vm468_vm0, %v434_v27  ;;  %v345_v49 = vld [vmem:[%s3843_s18 + $0x70] sm:$0xff]  ;;  %v410_v50 = vld [vmem:[%s3837_s15 + $0x78] sm:$0xff]  ;;  %v411_v52 = vld [vmem:[%s3837_s15 + $0x80] sm:$0xff] }
  0x20   : > { %3428 = vmatprep.mubr.msk.f32.mxu0 %vm468_vm0, %v403_v28  ;;  %3476 = vmatprep.mubr.msk.f32.mxu1 %vm468_vm0, %v435_v29  ;;  %v442_v51 = vld [vmem:[%s3837_s15 + $0x178] sm:$0xff]  ;;  %v443_v53 = vld [vmem:[%s3837_s15 + $0x180] sm:$0xff]  ;;  %v348_v54 = vld [vmem:[%s3843_s18 + $0x88] sm:$0xff] }
  0x21   : > { %1140 = vperm.xlu1 %3761, %v340_v30   ;;  %v347_v55 = vld [vmem:[%s3843_s18 + $0x80] sm:$0xff]  ;;  %v412_v56 = vld [vmem:[%s3837_s15 + $0x88] sm:$0xff]  ;;  %v413_v58 = vld [vmem:[%s3837_s15 + $0x90] sm:$0xff] }
  0x22   : > { %3429 = vmatmul.mubr.msk.f32.gmra.mrb[8].mxu0 %vm468_vm0, %v404_v32  ;;  %v444_v57 = vld [vmem:[%s3837_s15 + $0x188] sm:$0xff]  ;;  %v445_v59 = vld [vmem:[%s3837_s15 + $0x190] sm:$0xff]  ;;  %v350_v60 = vld [vmem:[%s3843_s18 + $0x98] sm:$0xff] }
  0x23   : > { %1137 = vperm.xlu0 %3760, %v339_v31   ;;  %3477 = vmatmul.mubr.msk.f32.gmra.mrb[8].mxu1 %vm468_vm0, %v436_v33  ;;  %v349_v61 = vld [vmem:[%s3843_s18 + $0x90] sm:$0xff]  ;;  %v414_v62 = vld [vmem:[%s3837_s15 + $0x98] sm:$0xff]  ;;  %v415_v0 = vld [vmem:[%s3837_s15 + $0xa0] sm:$0xff] }
  0x24   : > { %3431 = vmatprep.mubr.msk.f32.mxu0 %vm468_vm0, %v405_v34  ;;  %3479 = vmatprep.mubr.msk.f32.mxu1 %vm468_vm0, %v437_v35  ;;  %v446_v63 = vld [vmem:[%s3837_s15 + $0x198] sm:$0xff]  ;;  %v447_v1 = vld [vmem:[%s3837_s15 + $0x1a0] sm:$0xff]  ;;  %v352_v2 = vld [vmem:[%s3843_s18 + $0xa8] sm:$0xff] }
  0x25   : > { %1146 = vperm.xlu1 %3761, %v342_v36   ;;  %v351_v3 = vld [vmem:[%s3843_s18 + $0xa0] sm:$0xff]  ;;  %v416_v4 = vld [vmem:[%s3837_s15 + $0xa8] sm:$0xff]  ;;  %v417_v6 = vld [vmem:[%s3837_s15 + $0xb0] sm:$0xff] }
  0x26   : > { %3432 = vmatmul.mubr.msk.f32.gmra.mrb[10].mxu0 %vm468_vm0, %v406_v38  ;;  %v448_v5 = vld [vmem:[%s3837_s15 + $0x1a8] sm:$0xff]  ;;  %v449_v7 = vld [vmem:[%s3837_s15 + $0x1b0] sm:$0xff]  ;;  %v1560_v8 = vld [vmem:[%s4934_s4] sm:$0xff] }
  0x27   : > { %1143 = vperm.xlu0 %3760, %v341_v37   ;;  %3480 = vmatmul.mubr.msk.f32.gmra.mrb[10].mxu1 %vm468_vm0, %v438_v39  ;;  %v354_v9 = vld [vmem:[%s3843_s18 + $0xb8] sm:$0xff]  ;;  %v353_v10 = vld [vmem:[%s3843_s18 + $0xb0] sm:$0xff]  ;;  %v1561_v11 = vld [vmem:[%s4934_s4 + $0x8] sm:$0xff] }
  0x28   : > { %3434 = vmatprep.mubr.msk.f32.mxu0 %vm468_vm0, %v407_v40  ;;  %3482 = vmatprep.mubr.msk.f32.mxu1 %vm468_vm0, %v439_v41  ;;  %v418_v12 = vld [vmem:[%s3837_s15 + $0xb8] sm:$0xff]  ;;  %v419_v14 = vld [vmem:[%s3837_s15 + $0xc0] sm:$0xff]  ;;  %v3728_v16 = vpack.c.bf16 %v1561_v11, %v1560_v8  ;;  %v356_v17 = vld [vmem:[%s3843_s18 + $0xc8] sm:$0xff] }
  0x29   : > { %1152 = vperm.xlu1 %3761, %v344_v42   ;;  %v450_v13 = vld [vmem:[%s3837_s15 + $0x1b8] sm:$0xff]  ;;  %v451_v15 = vld [vmem:[%s3837_s15 + $0x1c0] sm:$0xff]  ;;  %v420_v19 = vld [vmem:[%s3837_s15 + $0xc8] sm:$0xff] }
  0x2a   : > { %3435 = vmatmul.mubr.msk.f32.gmra.mrb[12].mxu0 %vm468_vm0, %v408_v44  ;;  %v355_v18 = vld [vmem:[%s3843_s18 + $0xc0] sm:$0xff]  ;;  %v452_v20 = vld [vmem:[%s3837_s15 + $0x1c8] sm:$0xff]  ;;  %v421_v21 = vld [vmem:[%s3837_s15 + $0xd0] sm:$0xff]  ;;  %3729 = vmatprep.subr.bf16.mxu1 %v3728_v16 }
  0x2b   : > { %1149 = vperm.xlu0 %3760, %v343_v43   ;;  %3483 = vmatmul.mubr.msk.f32.gmra.mrb[12].mxu1 %vm468_vm0, %v440_v45  ;;  %v453_v22 = vld [vmem:[%s3837_s15 + $0x1d0] sm:$0xff]  ;;  %v358_v23 = vld [vmem:[%s3843_s18 + $0xd8] sm:$0xff]  ;;  %v423_v29 = vld [vmem:[%s3837_s15 + $0xe0] sm:$0xff] }
  0x2c   : > { %3437 = vmatprep.mubr.msk.f32.mxu0 %vm468_vm0, %v409_v46  ;;  %3485 = vmatprep.mubr.msk.f32.mxu1 %vm468_vm0, %v441_v47  ;;  %v357_v24 = vld [vmem:[%s3843_s18 + $0xd0] sm:$0xff]  ;;  %v1563_v26 = vld [vmem:[%s4934_s4 + $0x18] sm:$0xff]  ;;  %v455_v30 = vld [vmem:[%s3837_s15 + $0x1e0] sm:$0xff] }
  0x2d   : > { %1158 = vperm.xlu1 %3761, %v346_v48   ;;  %v1562_v25 = vld [vmem:[%s4934_s4 + $0x10] sm:$0xff]  ;;  %v422_v27 = vld [vmem:[%s3837_s15 + $0xd8] sm:$0xff]  ;;  %3731 = vmatpush3.bf16.msra.mxu1 %v3728_v16  ;;  %v360_v32 = vld [vmem:[%s3843_s18 + $0xe8] sm:$0xff] }
  0x2e   : > { %3438 = vmatmul.mubr.msk.f32.gmra.mrb[14].mxu0 %vm468_vm0, %v410_v50  ;;  %v454_v28 = vld [vmem:[%s3837_s15 + $0x1d8] sm:$0xff]  ;;  %v3732_v31 = vpack.c.bf16 %v1563_v26, %v1562_v25  ;;  %v359_v33 = vld [vmem:[%s3843_s18 + $0xe0] sm:$0xff]  ;;  %v424_v34 = vld [vmem:[%s3837_s15 + $0xe8] sm:$0xff] }
  0x2f   : > { %1155 = vperm.xlu0 %3760, %v345_v49   ;;  %3486 = vmatmul.mubr.msk.f32.gmra.mrb[14].mxu1 %vm468_vm0, %v442_v51  ;;  %v456_v35 = vld [vmem:[%s3837_s15 + $0x1e8] sm:$0xff]  ;;  %v425_v36 = vld [vmem:[%s3837_s15 + $0xf0] sm:$0xff]  ;;  %v362_v38 = vld [vmem:[%s3843_s18 + $0xf8] sm:$0xff] }
  0x30   : > { %3440 = vmatprep.mubr.msk.f32.mxu0 %vm468_vm0, %v411_v52  ;;  %3488 = vmatprep.mubr.msk.f32.mxu1 %vm468_vm0, %v443_v53  ;;  %v457_v37 = vld [vmem:[%s3837_s15 + $0x1f0] sm:$0xff]  ;;  %v426_v40 = vld [vmem:[%s3837_s15 + $0xf8] sm:$0xff]  ;;  %v364_v42 = vld [vmem:[%s3843_s18 + $0x108] sm:$0xff] }
  0x31   : > { %1164 = vperm.xlu1 %3761, %v348_v54   ;;  %3733 = vmatprep.subr.bf16.mxu1 %v3732_v31  ;;  %v361_v39 = vld [vmem:[%s3843_s18 + $0xf0] sm:$0xff]  ;;  %v458_v41 = vld [vmem:[%s3837_s15 + $0x1f8] sm:$0xff]  ;;  %v363_v43 = vld [vmem:[%s3843_s18 + $0x100] sm:$0xff] }
  0x32   : > { %3441 = vmatmul.mubr.msk.f32.gmra.mrb[16].mxu0 %vm468_vm0, %v412_v56  ;;  %3735 = vmatpush3.bf16.msra.mxu1 %v3732_v31  ;;  %v366_v44 = vld [vmem:[%s3843_s18 + $0x118] sm:$0xff]  ;;  %v365_v45 = vld [vmem:[%s3843_s18 + $0x110] sm:$0xff]  ;;  %v368_v46 = vld [vmem:[%s3843_s18 + $0x128] sm:$0xff] }
  0x33   : > { %1161 = vperm.xlu0 %3760, %v347_v55   ;;  %3489 = vmatmul.mubr.msk.f32.gmra.mrb[16].mxu1 %vm468_vm0, %v444_v57  ;;  %v367_v47 = vld [vmem:[%s3843_s18 + $0x120] sm:$0xff]  ;;  %v1565_v49 = vld [vmem:[%s4934_s4 + $0x28] sm:$0xff]  ;;  %v370_v51 = vld [vmem:[%s3843_s18 + $0x138] sm:$0xff] }
  0x34   : > { %3443 = vmatprep.mubr.msk.f32.mxu0 %vm468_vm0, %v413_v58  ;;  %3491 = vmatprep.mubr.msk.f32.mxu1 %vm468_vm0, %v445_v59  ;;  %v1564_v48 = vld [vmem:[%s4934_s4 + $0x20] sm:$0xff]  ;;  %v369_v52 = vld [vmem:[%s3843_s18 + $0x130] sm:$0xff]  ;;  %v372_v53 = vld [vmem:[%s3843_s18 + $0x148] sm:$0xff] }
  0x35   : > { %1170 = vperm.xlu1 %3761, %v350_v60   ;;  %v3736_v50 = vpack.c.bf16 %v1565_v49, %v1564_v48  ;;  %v371_v54 = vld [vmem:[%s3843_s18 + $0x140] sm:$0xff]  ;;  %v374_v55 = vld [vmem:[%s3843_s18 + $0x158] sm:$0xff]  ;;  %v373_v56 = vld [vmem:[%s3843_s18 + $0x150] sm:$0xff] }
  0x36   : > { %3444 = vmatmul.mubr.msk.f32.gmra.mrb[18].mxu0 %vm468_vm0, %v414_v62  ;;  %v376_v57 = vld [vmem:[%s3843_s18 + $0x168] sm:$0xff]  ;;  %v375_v58 = vld [vmem:[%s3843_s18 + $0x160] sm:$0xff]  ;;  %v378_v59 = vld [vmem:[%s3843_s18 + $0x178] sm:$0xff] }
  0x37   : > { %1167 = vperm.xlu0 %3760, %v349_v61   ;;  %3492 = vmatmul.mubr.msk.f32.gmra.mrb[18].mxu1 %vm468_vm0, %v446_v63  ;;  %v377_v60 = vld [vmem:[%s3843_s18 + $0x170] sm:$0xff]  ;;  %v380_v61 = vld [vmem:[%s3843_s18 + $0x188] sm:$0xff]  ;;  %v379_v62 = vld [vmem:[%s3843_s18 + $0x180] sm:$0xff] }
  0x38   : > { %3446 = vmatprep.mubr.msk.f32.mxu0 %vm468_vm0, %v415_v0  ;;  %3494 = vmatprep.mubr.msk.f32.mxu1 %vm468_vm0, %v447_v1  ;;  %v382_v63 = vld [vmem:[%s3843_s18 + $0x198] sm:$0xff]  ;;  %v381_v0 = vld [vmem:[%s3843_s18 + $0x190] sm:$0xff]  ;;  %v384_v1 = vld [vmem:[%s3843_s18 + $0x1a8] sm:$0xff] }
  0x39   : > { %1176 = vperm.xlu1 %3761, %v352_v2   ;;  %3737 = vmatprep.subr.bf16.mxu1 %v3736_v50  ;;  %v383_v2 = vld [vmem:[%s3843_s18 + $0x1a0] sm:$0xff]  ;;  %v389_v8 = vld [vmem:[%s3843_s18 + $0x1d0] sm:$0xff]  ;;  %v394_v11 = vld [vmem:[%s3843_s18 + $0x1f8] sm:$0xff] }
  0x3a   : > { %3447 = vmatmul.mubr.msk.f32.gmra.mrb[20].mxu0 %vm468_vm0, %v416_v4  ;;  %3739 = vmatpush3.bf16.msra.mxu1 %v3736_v50  ;;  %v385_v4 = vld [vmem:[%s3843_s18 + $0x1b0] sm:$0xff] }
  0x3b   : > { %1173 = vperm.xlu0 %3760, %v351_v3   ;;  %3495 = vmatmul.mubr.msk.f32.gmra.mrb[20].mxu1 %vm468_vm0, %v448_v5  ;;  %v386_v3 = vld [vmem:[%s3843_s18 + $0x1b8] sm:$0xff]  ;;  %v388_v5 = vld [vmem:[%s3843_s18 + $0x1c8] sm:$0xff] }
  0x3c   : > { %3449 = vmatprep.mubr.msk.f32.mxu0 %vm468_vm0, %v417_v6  ;;  %3497 = vmatprep.mubr.msk.f32.mxu1 %vm468_vm0, %v449_v7  ;;  %v387_v6 = vld [vmem:[%s3843_s18 + $0x1c0] sm:$0xff]  ;;  %v390_v7 = vld [vmem:[%s3843_s18 + $0x1d8] sm:$0xff] }
  0x3d   : > { %1182 = vperm.xlu1 %3761, %v354_v9   ;;  %v392_v9 = vld [vmem:[%s3843_s18 + $0x1e8] sm:$0xff] }
  0x3e   : > { %3450 = vmatmul.mubr.msk.f32.gmra.mrb[22].mxu0 %vm468_vm0, %v418_v12  ;;  %v393_v12 = vld [vmem:[%s3843_s18 + $0x1f0] sm:$0xff] }
  0x3f   : > { %1179 = vperm.xlu0 %3760, %v353_v10   ;;  %3498 = vmatmul.mubr.msk.f32.gmra.mrb[22].mxu1 %vm468_vm0, %v450_v13  ;;  %v391_v10 = vld [vmem:[%s3843_s18 + $0x1e0] sm:$0xff] }
  0x40   : > { %3452 = vmatprep.mubr.msk.f32.mxu0 %vm468_vm0, %v419_v14  ;;  %3500 = vmatprep.mubr.msk.f32.mxu1 %vm468_vm0, %v451_v15 }
  0x41   : > { %1188 = vperm.xlu1 %3761, %v356_v17  }
  0x42   : > { %3453 = vmatmul.mubr.msk.f32.gmra.mrb[24].mxu0 %vm468_vm0, %v420_v19 }
  0x43   : > { %1185 = vperm.xlu0 %3760, %v355_v18   ;;  %3501 = vmatmul.mubr.msk.f32.gmra.mrb[24].mxu1 %vm468_vm0, %v452_v20 }
  0x44   : > { %3455 = vmatprep.mubr.msk.f32.mxu0 %vm468_vm0, %v421_v21  ;;  %3503 = vmatprep.mubr.msk.f32.mxu1 %vm468_vm0, %v453_v22 }
  0x45   : > { %1194 = vperm.xlu1 %3761, %v358_v23  }
  0x46   : > { %3456 = vmatmul.mubr.msk.f32.gmra.mrb[26].mxu0 %vm468_vm0, %v422_v27 }
  0x47   : > { %1191 = vperm.xlu0 %3760, %v357_v24   ;;  %3504 = vmatmul.mubr.msk.f32.gmra.mrb[26].mxu1 %vm468_vm0, %v454_v28 }
  0x48   : > { %3458 = vmatprep.mubr.msk.f32.mxu0 %vm468_vm0, %v423_v29  ;;  %3506 = vmatprep.mubr.msk.f32.mxu1 %vm468_vm0, %v455_v30 }
  0x49   : > { %1200 = vperm.xlu1 %3761, %v360_v32  }
  0x4a   : > { %3459 = vmatmul.mubr.msk.f32.gmra.mrb[28].mxu0 %vm468_vm0, %v424_v34 }
  0x4b   : > { %1197 = vperm.xlu0 %3760, %v359_v33   ;;  %3507 = vmatmul.mubr.msk.f32.gmra.mrb[28].mxu1 %vm468_vm0, %v456_v35 }
  0x4c   : > { %3461 = vmatprep.mubr.msk.f32.mxu0 %vm468_vm0, %v425_v36  ;;  %3509 = vmatprep.mubr.msk.f32.mxu1 %vm468_vm0, %v457_v37 }
  0x4d   : > { %1206 = vperm.xlu1 %3761, %v362_v38   ;;  %v1110_v38 = vlaneseq }
  0x4e   : > { %3462 = vmatmul.mubr.msk.f32.gmra.mrb[30].mxu0 %vm468_vm0, %v426_v40 }
  0x4f   : > { %1203 = vperm.xlu0 %3760, %v361_v39   ;;  %3510 = vmatmul.mubr.msk.f32.gmra.mrb[30].mxu1 %vm468_vm0, %v458_v41  ;;  %v4103_v40 = vand.u32 127, %v1110_v38  ;;  %v4108_v41 = vld [vmem:[%s4933_s3] ss:$0 sm:$0xff] }
  0x51   : > { %1212 = vperm.xlu1 %3761, %v364_v42  }
  0x53   : > { %1209 = vperm.xlu0 %3760, %v363_v43  }
  0x55   : > { %1218 = vperm.xlu1 %3761, %v366_v44  }
  0x57   : > { %1215 = vperm.xlu0 %3760, %v365_v45  }
  0x59   : > { %1224 = vperm.xlu1 %3761, %v368_v46  }
  0x5b   : > { %1221 = vperm.xlu0 %3760, %v367_v47  }
  0x5d   : > { %1230 = vperm.xlu1 %3761, %v370_v51  }
  0x5f   : > { %1227 = vperm.xlu0 %3760, %v369_v52  }
  0x61   : > { %1236 = vperm.xlu1 %3761, %v372_v53  }
  0x63   : > { %1233 = vperm.xlu0 %3760, %v371_v54  }
  0x65   : > { %1242 = vperm.xlu1 %3761, %v374_v55   ;;  %v3771_v55 = vmov 0.0  }
  0x67   : > { %1239 = vperm.xlu0 %3760, %v373_v56  }
  0x69   : > { %1248 = vperm.xlu1 %3761, %v376_v57  }
  0x6b   : > { %1245 = vperm.xlu0 %3760, %v375_v58  }
  0x6d   : > { %1254 = vperm.xlu1 %3761, %v378_v59  }
  0x6f   : > { %1251 = vperm.xlu0 %3760, %v377_v60  }
  0x71   : > { %1260 = vperm.xlu1 %3761, %v380_v61  }
  0x73   : > { %1257 = vperm.xlu0 %3760, %v379_v62  }
  0x75   : > { %1266 = vperm.xlu1 %3761, %v382_v63   ;;  %v2215_v63 = vld [vmem:[%s4936_s6] sm:$0xff] }
  0x77   : > { %1263 = vperm.xlu0 %3760, %v381_v0   ;;  %v2216_v0 = vld [vmem:[%s4936_s6 + $0x8] sm:$0xff] }
  0x79   : > { %1272 = vperm.xlu1 %3761, %v384_v1  }
  0x7b   : > { %1269 = vperm.xlu0 %3760, %v383_v2  }
  0x7d   : > { %1278 = vperm.xlu1 %3761, %v386_v3  }
  0x7f   : > { %1275 = vperm.xlu0 %3760, %v385_v4  }
  0x81   : > { %1284 = vperm.xlu1 %3761, %v388_v5   ;;  %v3740_v5 = vpack.c.bf16 %v2216_v0, %v2215_v63 }
  0x83   : > { %1281 = vperm.xlu0 %3760, %v387_v6   ;;  %3741 = vmatprep.subr.bf16.mxu0 %v3740_v5 }
  0x84   : > { %3743 = vmatpush3.bf16.msra.mxu0 %v3740_v5 }
  0x85   : > { %1290 = vperm.xlu1 %3761, %v390_v7  }
  0x87   : > { %1287 = vperm.xlu0 %3760, %v389_v8  }
  0x89   : > { %1296 = vperm.xlu1 %3761, %v392_v9  }
  0x8b   : > { %1293 = vperm.xlu0 %3760, %v391_v10  }
  0x8d   : > { %1302 = vperm.xlu1 %3761, %v394_v11  }
  0x8f   : > { %1299 = vperm.xlu0 %3760, %v393_v12  }
  0x90   : > { %v4055_v14 = vpop.permute.xlu1 %1119 }
  0x91   : > { %vm1306_vm3 = vcmp.eq.s32.totalorder %v4103_v40, %v4055_v14 }
  0x92   : > { %v1114_v13 = vpop.permute.xlu0 %1113  ;;  %v3014_v9 = vsel %vm1306_vm3, 1.0, %v3771_v55 }
  0x93   : > { %vm1304_vm1 = vcmp.eq.s32.totalorder %v4103_v40, %v1114_v13 }
  0x94   : > { %v4057_v16 = vpop.permute.xlu1 %1122  ;;  %v3012_v56 = vsel %vm1304_vm1, 1.0, %v3771_v55 }
  0x95   : > { %vm1307_vm4 = vcmp.eq.s32.totalorder %v4103_v40, %v4057_v16 }
  0x96   : > { %v1117_v15 = vpop.permute.xlu0 %1116  ;;  %v3015_v13 = vsel %vm1307_vm4, 1.0, %v3771_v55 }
  0x97   : > { %vm1305_vm2 = vcmp.eq.s32.totalorder %v4103_v40, %v1117_v15 }
  0x98   : > { %v4061_v18 = vpop.permute.xlu1 %1128  ;;  %v3013_v59 = vsel %vm1305_vm2, 1.0, %v3771_v55 }
  0x99   : > { %vm1309_vm6 = vcmp.eq.s32.totalorder %v4103_v40, %v4061_v18 }
  0x9a   : > { %v4059_v17 = vpop.permute.xlu0 %1125 }
  0x9b   : > { %vm1308_vm7 = vcmp.eq.s32.totalorder %v4103_v40, %v4059_v17 }
  0x9c   : > { %v4065_v20 = vpop.permute.xlu1 %1134  ;;  %v3016_v17 = vsel %vm1308_vm7, 1.0, %v3771_v55 }
  0x9d   : > { %vm1311_vm8 = vcmp.eq.s32.totalorder %v4103_v40, %v4065_v20 }
  0x9e   : > { %v4063_v19 = vpop.permute.xlu0 %1131 }
  0x9f   : > { %vm1310_vm9 = vcmp.eq.s32.totalorder %v4103_v40, %v4063_v19 }
  0xa0   : > { %v4069_v22 = vpop.permute.xlu1 %1140  ;;  %v3018_v19 = vsel %vm1310_vm9, 1.0, %v3771_v55 }
  0xa1   : > { %vm1313_vm10 = vcmp.eq.s32.totalorder %v4103_v40, %v4069_v22 }
  0xa2   : > { %v4067_v21 = vpop.permute.xlu0 %1137 }
  0xa3   : > { %vm1312_vm11 = vcmp.eq.s32.totalorder %v4103_v40, %v4067_v21 }
  0xa4   : > { %v4073_v24 = vpop.permute.xlu1 %1146  ;;  %v3020_v21 = vsel %vm1312_vm11, 1.0, %v3771_v55 }
  0xa5   : > { %vm1315_vm12 = vcmp.eq.s32.totalorder %v4103_v40, %v4073_v24 }
  0xa6   : > { %v4071_v23 = vpop.permute.xlu0 %1143 }
  0xa7   : > { %vm1314_vm13 = vcmp.eq.s32.totalorder %v4103_v40, %v4071_v23 }
  0xa8   : > { %v4077_v26 = vpop.permute.xlu1 %1152  ;;  %v3022_v23 = vsel %vm1314_vm13, 1.0, %v3771_v55 }
  0xa9   : > { %vm1317_vm14 = vcmp.eq.s32.totalorder %v4103_v40, %v4077_v26 }
  0xaa   : > { %v4075_v25 = vpop.permute.xlu0 %1149 }
  0xab   : > { %vm1316_vm15 = vcmp.eq.s32.totalorder %v4103_v40, %v4075_v25 }
  0xac   : > { %v4081_v28 = vpop.permute.xlu1 %1158  ;;  %v3024_v25 = vsel %vm1316_vm15, 1.0, %v3771_v55 }
  0xad   : > { %vm1319_vm1 = vcmp.eq.s32.totalorder %v4103_v40, %v4081_v28 }
  0xae   : > { %v4079_v27 = vpop.permute.xlu0 %1155 }
  0xaf   : > { %vm1318_vm2 = vcmp.eq.s32.totalorder %v4103_v40, %v4079_v27 }
  0xb0   : > { %v4085_v30 = vpop.permute.xlu1 %1164  ;;  %v3026_v27 = vsel %vm1318_vm2, 1.0, %v3771_v55 }
  0xb1   : > { %vm1321_vm3 = vcmp.eq.s32.totalorder %v4103_v40, %v4085_v30 }
  0xb2   : > { %v4083_v29 = vpop.permute.xlu0 %1161 }
  0xb3   : > { %vm1320_vm4 = vcmp.eq.s32.totalorder %v4103_v40, %v4083_v29 }
  0xb4   : > { %v4089_v32 = vpop.permute.xlu1 %1170  ;;  %v3028_v29 = vsel %vm1320_vm4, 1.0, %v3771_v55 }
  0xb6   : > { %v4087_v31 = vpop.permute.xlu0 %1167 }
  0xb7   : > { %vm1322_vm7 = vcmp.eq.s32.totalorder %v4103_v40, %v4087_v31 }
  0xb8   : > { %v4093_v34 = vpop.permute.xlu1 %1176 }
  0xb9   : > { %vm1325_vm9 = vcmp.eq.s32.totalorder %v4103_v40, %v4093_v34 }
  0xba   : > { %v4091_v33 = vpop.permute.xlu0 %1173 }
  0xbc   : > { %v4097_v36 = vpop.permute.xlu1 %1182 }
  0xbd   : > { %vm1327_vm11 = vcmp.eq.s32.totalorder %v4103_v40, %v4097_v36 }
  0xbe   : > { %v4095_v35 = vpop.permute.xlu0 %1179 }
  0xc0   : > { %v4101_v39 = vpop.permute.xlu1 %1188 }
  0xc1   : > { %vm1329_vm13 = vcmp.eq.s32.totalorder %v4103_v40, %v4101_v39 }
  0xc2   : > { %v4099_v37 = vpop.permute.xlu0 %1185 }
  0xc4   : > { %v4121_v50 = vpop.permute.xlu1 %1194 }
  0xc5   : > { %vm1331_vm15 = vcmp.eq.s32.totalorder %v4103_v40, %v4121_v50 }
  0xc6   : > { %v4110_v42 = vpop.permute.xlu0 %1191 }
  0xc8   : > { %v4163_v14 = vpop.permute.xlu1 %1200 }
  0xc9   : > { %vm1333_vm2 = vcmp.eq.s32.totalorder %v4103_v40, %v4163_v14 }
  0xca   : > { %v4139_v1 = vpop.permute.xlu0 %1197 }
  0xe5   : > { %v3418_v43 = vpop.f32.mrb[0].mxu0 }
  0xe6   : > { %v3466_v44 = vpop.f32.mrb[0].mxu1  ;;  %v733_v45 = vadd.f32 %v3418_v43, %v4108_v41  ;;  %v727_v47 = vpop.f32.mrb[1].mxu0 }
  0xe7   : > { %v4114_v46 = vadd.f32 %v3466_v44, %v4108_v41  ;;  %v4116_v48 = vpop.f32.mrb[1].mxu1  ;;  %v728_v49 = vadd.f32 %v4108_v41, %v727_v47 }
  0xe8   : > { %v1047_v51 = vmax.f32 %v733_v45, 0.0 }
  0xe9   : > { %v1046_v52 = vmax.f32 %v728_v49, 0.0  ;;  %v3421_v53 = vpop.f32.mrb[2].mxu0 }
  0xea   : > { %v3469_v54 = vpop.f32.mrb[2].mxu1  ;;  %v737_v57 = vpop.f32.mrb[3].mxu0  ;;  %v743_v61 = vadd.f32 %v3421_v53, %v4108_v41  ;;  %v1497_v2 = vadd.f32 %v3013_v59, %v1047_v51  ;;  %v3017_v51 = vsel %vm1309_vm6, 1.0, %v3771_v55  ;;  %vm1323_vm6 = vcmp.eq.s32.totalorder %v4103_v40, %v4089_v32 }
  0xeb   : > { %v897_v58 = vpop.f32.mrb[3].mxu1  ;;  %v1496_v60 = vadd.f32 %v3012_v56, %v1046_v52  ;;  %v4131_v62 = vadd.f32 %v3469_v54, %v4108_v41  ;;  %v738_v3 = vadd.f32 %v4108_v41, %v737_v57 }
  0xec   : > { %v4143_v4 = vadd.f32 %v4108_v41, %v897_v58  ;;  %v1049_v6 = vmax.f32 %v743_v61, 0.0  ;;  %v4181_v58 = vpop.permute.xlu0 %1203 }
  0xed   : > { %v3424_v7 = vpop.f32.mrb[4].mxu0  ;;  %3524 = vmatprep.mubr.msk.f32.mxu1 %vm1573_vm5, %v1496_v60  ;;  %v1048_v10 = vmax.f32 %v738_v3, 0.0  ;;  %v3019_v3 = vsel %vm1311_vm8, 1.0, %v3771_v55  ;;  %vm1324_vm8 = vcmp.eq.s32.totalorder %v4103_v40, %v4091_v33 }
  0xee   : > { %v3472_v8 = vpop.f32.mrb[4].mxu1  ;;  %v747_v11 = vpop.f32.mrb[5].mxu0  ;;  %3525 = vmatmul.mubr.msk.f32.vlgmr.msra.gmra.mrb[32].mxu1 %vm1573_vm5, %v1497_v2  ;;  %v753_v15 = vadd.f32 %v3424_v7, %v4108_v41  ;;  %v1499_v45 = vadd.f32 %v3015_v13, %v1049_v6 }
  0xef   : > { %v907_v12 = vpop.f32.mrb[5].mxu1  ;;  %v4159_v38 = vadd.f32 %v3472_v8, %v4108_v41  ;;  %v1498_v43 = vadd.f32 %v3014_v9, %v1048_v10  ;;  %v748_v44 = vadd.f32 %v4108_v41, %v747_v11  ;;  %v4199_v10 = vpop.permute.xlu1 %1206 }
  0xf0   : > { %v4167_v16 = vadd.f32 %v4108_v41, %v907_v12  ;;  %v1051_v47 = vmax.f32 %v753_v15, 0.0  ;;  %vm1335_vm4 = vcmp.eq.s32.totalorder %v4103_v40, %v4199_v10 }
  0xf1   : > { %v3427_v18 = vpop.f32.mrb[6].mxu0  ;;  %v1050_v52 = vmax.f32 %v748_v44, 0.0  ;;  %3527 = vmatprep.mubr.msk.f32.mxu1 %vm1573_vm5, %v1498_v43  ;;  %v3043_v10 = vsel %vm1335_vm4, 1.0, %v3771_v55 }
  0xf2   : > { %v3475_v49 = vpop.f32.mrb[6].mxu1  ;;  %v757_v53 = vpop.f32.mrb[7].mxu0  ;;  %v763_v56 = vadd.f32 %v3427_v18, %v4108_v41  ;;  %3528 = vmatmul.mubr.msk.f32.gmra.mrb[34].mxu1 %vm1573_vm5, %v1499_v45  ;;  %v1501_v63 = vadd.f32 %v3017_v51, %v1051_v47  ;;  %v3021_v45 = vsel %vm1313_vm10, 1.0, %v3771_v55  ;;  %vm1326_vm10 = vcmp.eq.s32.totalorder %v4103_v40, %v4095_v35 }
  0xf3   : > { %v917_v54 = vpop.f32.mrb[7].mxu1  ;;  %v4176_v57 = vadd.f32 %v3475_v49, %v4108_v41  ;;  %v1500_v59 = vadd.f32 %v3016_v17, %v1050_v52  ;;  %v758_v60 = vadd.f32 %v4108_v41, %v757_v53  ;;  %v4217_v53 = vpop.permute.xlu0 %1209 }
  0xf4   : > { %v4185_v61 = vadd.f32 %v4108_v41, %v917_v54  ;;  %v1053_v20 = vmax.f32 %v763_v56, 0.0 }
  0xf5   : > { %v3430_v0 = vpop.f32.mrb[8].mxu0  ;;  %v1052_v5 = vmax.f32 %v758_v60, 0.0  ;;  %3530 = vmatprep.mubr.msk.f32.mxu1 %vm1573_vm5, %v1500_v59 }
  0xf6   : > { %v3478_v2 = vpop.f32.mrb[8].mxu1  ;;  %v767_v6 = vpop.f32.mrb[9].mxu0  ;;  %v773_v8 = vadd.f32 %v3430_v0, %v4108_v41  ;;  %3531 = vmatmul.mubr.msk.f32.gmra.mrb[36].mxu1 %vm1573_vm5, %v1501_v63  ;;  %v1503_v15 = vadd.f32 %v3019_v3, %v1053_v20  ;;  %v3023_v20 = vsel %vm1315_vm12, 1.0, %v3771_v55  ;;  %vm1328_vm12 = vcmp.eq.s32.totalorder %v4103_v40, %v4099_v37 }
  0xf7   : > { %v927_v7 = vpop.f32.mrb[9].mxu1  ;;  %v4194_v9 = vadd.f32 %v3478_v2, %v4108_v41  ;;  %v1502_v11 = vadd.f32 %v3018_v19, %v1052_v5  ;;  %v768_v12 = vadd.f32 %v4108_v41, %v767_v6 }
  0xf8   : > { %v4203_v13 = vadd.f32 %v4108_v41, %v927_v7  ;;  %v1055_v22 = vmax.f32 %v773_v8, 0.0  ;;  %v4235_v7 = vpop.permute.xlu1 %1212 }
  0xf9   : > { %v3433_v43 = vpop.f32.mrb[10].mxu0  ;;  %v1054_v47 = vmax.f32 %v768_v12, 0.0  ;;  %3533 = vmatprep.mubr.msk.f32.mxu1 %vm1573_vm5, %v1502_v11 }
  0xfa   : > { %v3481_v44 = vpop.f32.mrb[10].mxu1  ;;  %v777_v18 = vpop.f32.mrb[11].mxu0  ;;  %v783_v51 = vadd.f32 %v3433_v43, %v4108_v41  ;;  %3534 = vmatmul.mubr.msk.f32.gmra.mrb[38].mxu1 %vm1573_vm5, %v1503_v15  ;;  %v1505_v59 = vadd.f32 %v3021_v45, %v1055_v22  ;;  %v3025_v43 = vsel %vm1317_vm14, 1.0, %v3771_v55  ;;  %vm1330_vm14 = vcmp.eq.s32.totalorder %v4103_v40, %v4110_v42 }
  0xfb   : > { %v937_v49 = vpop.f32.mrb[11].mxu1  ;;  %v4212_v52 = vadd.f32 %v3481_v44, %v4108_v41  ;;  %v1504_v54 = vadd.f32 %v3020_v21, %v1054_v47  ;;  %v778_v17 = vadd.f32 %v4108_v41, %v777_v18  ;;  %v4253_v21 = vpop.permute.xlu0 %1215 }
  0xfc   : > { %v4221_v56 = vadd.f32 %v4108_v41, %v937_v49  ;;  %v1057_v24 = vmax.f32 %v783_v51, 0.0 }
  0xfd   : > { %v3436_v60 = vpop.f32.mrb[12].mxu0  ;;  %v1056_v0 = vmax.f32 %v778_v17, 0.0  ;;  %3536 = vmatprep.mubr.msk.f32.mxu1 %vm1573_vm5, %v1504_v54 }
  0xfe   : > { %v3484_v63 = vpop.f32.mrb[12].mxu1  ;;  %v787_v2 = vpop.f32.mrb[13].mxu0  ;;  %v793_v5 = vadd.f32 %v3436_v60, %v4108_v41  ;;  %3537 = vmatmul.mubr.msk.f32.gmra.mrb[40].mxu1 %vm1573_vm5, %v1505_v59  ;;  %v1507_v12 = vadd.f32 %v3023_v20, %v1057_v24 }
  0xff   : > { %v947_v3 = vpop.f32.mrb[13].mxu1  ;;  %v4230_v6 = vadd.f32 %v3484_v63, %v4108_v41  ;;  %v1506_v19 = vadd.f32 %v3022_v23, %v1056_v0  ;;  %v788_v8 = vadd.f32 %v4108_v41, %v787_v2  ;;  %v3027_v63 = vsel %vm1319_vm1, 1.0, %v3771_v55 }
 0x100   : > { %v4239_v11 = vadd.f32 %v4108_v41, %v947_v3  ;;  %v1059_v26 = vmax.f32 %v793_v5, 0.0  ;;  %v4271_v5 = vpop.permute.xlu1 %1218  ;;  %vm1332_vm1 = vcmp.eq.s32.totalorder %v4103_v40, %v4139_v1 }
 0x101   : > { %v3439_v15 = vpop.f32.mrb[14].mxu0  ;;  %v1058_v44 = vmax.f32 %v788_v8, 0.0  ;;  %3539 = vmatprep.mubr.msk.f32.mxu1 %vm1573_vm5, %v1506_v19 }
 0x102   : > { %v3487_v22 = vpop.f32.mrb[14].mxu1  ;;  %v797_v45 = vpop.f32.mrb[15].mxu0  ;;  %v803_v18 = vadd.f32 %v3439_v15, %v4108_v41  ;;  %3540 = vmatmul.mubr.msk.f32.gmra.mrb[42].mxu1 %vm1573_vm5, %v1507_v12  ;;  %v1509_v59 = vadd.f32 %v3025_v43, %v1059_v26  ;;  %v3029_v43 = vsel %vm1321_vm3, 1.0, %v3771_v55  ;;  %vm1334_vm3 = vcmp.eq.s32.totalorder %v4103_v40, %v4181_v58 }
 0x103   : > { %v957_v47 = vpop.f32.mrb[15].mxu1  ;;  %v4248_v49 = vadd.f32 %v3487_v22, %v4108_v41  ;;  %v1508_v51 = vadd.f32 %v3024_v25, %v1058_v44  ;;  %v798_v54 = vadd.f32 %v4108_v41, %v797_v45 }
 0x104   : > { %v4257_v17 = vadd.f32 %v4108_v41, %v957_v47  ;;  %v1061_v28 = vmax.f32 %v803_v18, 0.0 }
 0x105   : > { %v3442_v24 = vpop.f32.mrb[16].mxu0  ;;  %v1060_v20 = vmax.f32 %v798_v54, 0.0  ;;  %3542 = vmatprep.mubr.msk.f32.mxu1 %vm1573_vm5, %v1508_v51  ;;  %v4289_v51 = vpop.permute.xlu0 %1221 }
 0x106   : > { %v3490_v60 = vpop.f32.mrb[16].mxu1  ;;  %v807_v0 = vpop.f32.mrb[17].mxu0  ;;  %v813_v3 = vadd.f32 %v3442_v24, %v4108_v41  ;;  %3543 = vmatmul.mubr.msk.f32.gmra.mrb[44].mxu1 %vm1573_vm5, %v1509_v59  ;;  %v1511_v26 = vadd.f32 %v3027_v63, %v1061_v28 }
 0x107   : > { %v967_v2 = vpop.f32.mrb[17].mxu1  ;;  %v4266_v23 = vadd.f32 %v3490_v60, %v4108_v41  ;;  %v1510_v19 = vadd.f32 %v3026_v27, %v1060_v20  ;;  %v808_v8 = vadd.f32 %v4108_v41, %v807_v0 }
 0x108   : > { %v4275_v12 = vadd.f32 %v4108_v41, %v967_v2  ;;  %v1063_v30 = vmax.f32 %v813_v3, 0.0  ;;  %v2217_v3 = vld [vmem:[%s4936_s6 + $0x10] sm:$0xff] }
 0x109   : > { %v3445_v15 = vpop.f32.mrb[18].mxu0  ;;  %v1062_v44 = vmax.f32 %v808_v8, 0.0  ;;  %3545 = vmatprep.mubr.msk.f32.mxu1 %vm1573_vm5, %v1510_v19  ;;  %v2218_v19 = vld [vmem:[%s4936_s6 + $0x18] sm:$0xff]  ;;  %v3031_v8 = vsel %vm1323_vm6, 1.0, %v3771_v55  ;;  %vm1336_vm6 = vcmp.eq.s32.totalorder %v4103_v40, %v4217_v53 }
 0x10a   : > { %v3493_v22 = vpop.f32.mrb[18].mxu1  ;;  %v817_v45 = vpop.f32.mrb[19].mxu0  ;;  %v823_v25 = vadd.f32 %v3445_v15, %v4108_v41  ;;  %3546 = vmatmul.mubr.msk.f32.gmra.mrb[46].mxu1 %vm1573_vm5, %v1511_v26  ;;  %v1513_v24 = vadd.f32 %v3029_v43, %v1063_v30  ;;  %v3030_v26 = vsel %vm1322_vm7, 1.0, %v3771_v55  ;;  %vm1337_vm7 = vcmp.eq.s32.totalorder %v4103_v40, %v4235_v7 }
 0x10b   : > { %v977_v47 = vpop.f32.mrb[19].mxu1  ;;  %v4284_v18 = vadd.f32 %v3493_v22, %v4108_v41  ;;  %v1512_v54 = vadd.f32 %v3028_v29, %v1062_v44  ;;  %v818_v59 = vadd.f32 %v4108_v41, %v817_v45  ;;  %v4317_v22 = vpop.permute.xlu1 %1224  ;;  %v3045_v53 = vsel %vm1337_vm7, 1.0, %v3771_v55 }
 0x10c   : > { %v4293_v28 = vadd.f32 %v4108_v41, %v977_v47  ;;  %v1065_v60 = vmax.f32 %v823_v25, 0.0  ;;  %v3744_v25 = vpack.c.bf16 %v2218_v19, %v2217_v3  ;;  %v4345_v3 = vpop.permute.xlu0 %1227 }
 0x10d   : > { %v3448_v63 = vpop.f32.mrb[20].mxu0  ;;  %v1064_v0 = vmax.f32 %v818_v59, 0.0  ;;  %3548 = vmatprep.mubr.msk.f32.mxu1 %vm1573_vm5, %v1512_v54 }
 0x10e   : > { %v3496_v20 = vpop.f32.mrb[20].mxu1  ;;  %v827_v2 = vpop.f32.mrb[21].mxu0  ;;  %v833_v30 = vadd.f32 %v3448_v63, %v4108_v41  ;;  %3549 = vmatmul.mubr.msk.f32.gmra.mrb[48].mxu1 %vm1573_vm5, %v1513_v24  ;;  %v1515_v31 = vadd.f32 %v3031_v8, %v1065_v60  ;;  %3745 = vmatprep.subr.bf16.mxu0 %v3744_v25 }
 0x10f   : > { %v987_v27 = vpop.f32.mrb[21].mxu1  ;;  %v4312_v15 = vadd.f32 %v3496_v20, %v4108_v41  ;;  %v1514_v43 = vadd.f32 %v3030_v26, %v1064_v0  ;;  %v828_v32 = vadd.f32 %v4108_v41, %v827_v2  ;;  %v3032_v0 = vsel %vm1324_vm8, 1.0, %v3771_v55  ;;  %3747 = vmatpush3.bf16.msra.mxu0 %v3744_v25 }
 0x110   : > { %v4321_v44 = vadd.f32 %v4108_v41, %v987_v27  ;;  %v1067_v45 = vmax.f32 %v833_v30, 0.0  ;;  %v3033_v27 = vsel %vm1325_vm9, 1.0, %v3771_v55  ;;  %v3035_v25 = vsel %vm1327_vm11, 1.0, %v3771_v55 }
 0x111   : > { %v3451_v47 = vpop.f32.mrb[22].mxu0  ;;  %v1066_v54 = vmax.f32 %v828_v32, 0.0  ;;  %3551 = vmatprep.mubr.msk.f32.mxu1 %vm1573_vm5, %v1514_v43  ;;  %v3034_v43 = vsel %vm1326_vm10, 1.0, %v3771_v55  ;;  %vm1338_vm8 = vcmp.eq.s32.totalorder %v4103_v40, %v4253_v21  ;;  %vm1339_vm9 = vcmp.eq.s32.totalorder %v4103_v40, %v4271_v5 }
 0x112   : > { %v3499_v29 = vpop.f32.mrb[22].mxu1  ;;  %v843_v59 = vadd.f32 %v3451_v47, %v4108_v41  ;;  %v837_v63 = vpop.f32.mrb[23].mxu0  ;;  %3552 = vmatmul.mubr.msk.f32.gmra.mrb[50].mxu1 %vm1573_vm5, %v1515_v31  ;;  %v1517_v33 = vadd.f32 %v3033_v27, %v1067_v45  ;;  %v3036_v27 = vsel %vm1328_vm12, 1.0, %v3771_v55  ;;  %vm1340_vm10 = vcmp.eq.s32.totalorder %v4103_v40, %v4289_v51 }
 0x113   : > { %v4327_v24 = vadd.f32 %v3499_v29, %v4108_v41  ;;  %v997_v20 = vpop.f32.mrb[23].mxu1  ;;  %v838_v60 = vadd.f32 %v4108_v41, %v837_v63  ;;  %v1516_v19 = vadd.f32 %v3032_v0, %v1066_v54  ;;  %vm1341_vm11 = vcmp.eq.s32.totalorder %v4103_v40, %v4317_v22 }
 0x114   : > { %v4338_v2 = vadd.f32 %v4108_v41, %v997_v20  ;;  %v1069_v35 = vmax.f32 %v843_v59, 0.0  ;;  %v4366_v59 = vpop.permute.xlu1 %1230  ;;  %v3048_v5 = vsel %vm1340_vm10, 1.0, %v3771_v55  ;;  %vm1342_vm12 = vcmp.eq.s32.totalorder %v4103_v40, %v4345_v3 }
 0x115   : > { %v1068_v8 = vmax.f32 %v838_v60, 0.0  ;;  %v3454_v26 = vpop.f32.mrb[24].mxu0  ;;  %3554 = vmatprep.mubr.msk.f32.mxu1 %vm1573_vm5, %v1516_v19  ;;  %v3050_v22 = vsel %vm1342_vm12, 1.0, %v3771_v55 }
 0x116   : > { %v3502_v30 = vpop.f32.mrb[24].mxu1  ;;  %v853_v32 = vadd.f32 %v3454_v26, %v4108_v41  ;;  %v847_v31 = vpop.f32.mrb[25].mxu0  ;;  %3555 = vmatmul.mubr.msk.f32.gmra.mrb[52].mxu1 %vm1573_vm5, %v1517_v33  ;;  %v1519_v63 = vadd.f32 %v3035_v25, %v1069_v35  ;;  %v3038_v25 = vsel %vm1330_vm14, 1.0, %v3771_v55 }
 0x117   : > { %v4352_v34 = vadd.f32 %v3502_v30, %v4108_v41  ;;  %v1007_v47 = vpop.f32.mrb[25].mxu1  ;;  %v1518_v45 = vadd.f32 %v3034_v43, %v1068_v8  ;;  %v848_v29 = vadd.f32 %v4108_v41, %v847_v31  ;;  %v3037_v43 = vsel %vm1329_vm13, 1.0, %v3771_v55 }
 0x118   : > { %v4359_v54 = vadd.f32 %v4108_v41, %v1007_v47  ;;  %v1071_v37 = vmax.f32 %v853_v32, 0.0  ;;  %v4387_v32 = vpop.permute.xlu0 %1233  ;;  %vm1343_vm13 = vcmp.eq.s32.totalorder %v4103_v40, %v4366_v59 }
 0x119   : > { %v1070_v20 = vmax.f32 %v848_v29, 0.0  ;;  %v3457_v0 = vpop.f32.mrb[26].mxu0  ;;  %3557 = vmatprep.mubr.msk.f32.mxu1 %vm1573_vm5, %v1518_v45  ;;  %vm1344_vm14 = vcmp.eq.s32.totalorder %v4103_v40, %v4387_v32 }
 0x11a   : > { %v3505_v60 = vpop.f32.mrb[26].mxu1  ;;  %v863_v19 = vadd.f32 %v3457_v0, %v4108_v41  ;;  %v857_v36 = vpop.f32.mrb[27].mxu0  ;;  %3558 = vmatmul.mubr.msk.f32.gmra.mrb[54].mxu1 %vm1573_vm5, %v1519_v63  ;;  %v1521_v31 = vadd.f32 %v3037_v43, %v1071_v37  ;;  %v3052_v59 = vsel %vm1344_vm14, 1.0, %v3771_v55 }
 0x11b   : > { %v4374_v33 = vadd.f32 %v3505_v60, %v4108_v41  ;;  %v1017_v8 = vpop.f32.mrb[27].mxu1  ;;  %v1520_v26 = vadd.f32 %v3036_v27, %v1070_v20  ;;  %v858_v35 = vadd.f32 %v4108_v41, %v857_v36  ;;  %v4408_v36 = vpop.permute.xlu1 %1236 }
 0x11c   : > { %v4380_v30 = vadd.f32 %v4108_v41, %v1017_v8  ;;  %v1073_v42 = vmax.f32 %v863_v19, 0.0  ;;  %v3039_v19 = vsel %vm1331_vm15, 1.0, %v3771_v55  ;;  %vm1345_vm15 = vcmp.eq.s32.totalorder %v4103_v40, %v4408_v36 }
 0x11d   : > { %v1072_v47 = vmax.f32 %v858_v35, 0.0  ;;  %v3460_v45 = vpop.f32.mrb[28].mxu0  ;;  %3560 = vmatprep.mubr.msk.f32.mxu1 %vm1573_vm5, %v1520_v26 }
 0x11e   : > { %v3508_v29 = vpop.f32.mrb[28].mxu1  ;;  %v873_v63 = vadd.f32 %v3460_v45, %v4108_v41  ;;  %v867_v39 = vpop.f32.mrb[29].mxu0  ;;  %3561 = vmatmul.mubr.msk.f32.gmra.mrb[56].mxu1 %vm1573_vm5, %v1521_v31  ;;  %v1523_v8 = vadd.f32 %v3039_v19, %v1073_v42  ;;  %v888_v31 = vadd.f32 %v4108_v41, %v4116_v48  ;;  %v3041_v48 = vsel %vm1333_vm2, 1.0, %v3771_v55 }
 0x11f   : > { %v4395_v20 = vadd.f32 %v3508_v29, %v4108_v41  ;;  %v1027_v0 = vpop.f32.mrb[29].mxu1  ;;  %v1522_v60 = vadd.f32 %v3038_v25, %v1072_v47  ;;  %v868_v37 = vadd.f32 %v4108_v41, %v867_v39  ;;  %v3040_v47 = vsel %vm1332_vm1, 1.0, %v3771_v55  ;;  %v4422_v42 = vpop.permute.xlu0 %1239 }
 0x120   : > { %v4401_v27 = vadd.f32 %v4108_v41, %v1027_v0  ;;  %v1075_v1 = vmax.f32 %v873_v63, 0.0  ;;  %v3042_v19 = vsel %vm1334_vm3, 1.0, %v3771_v55  ;;  %vm1346_vm1 = vcmp.eq.s32.totalorder %v4103_v40, %v4422_v42 }
 0x121   : > { %v1074_v26 = vmax.f32 %v868_v37, 0.0  ;;  %v3463_v35 = vpop.f32.mrb[30].mxu0  ;;  %3563 = vmatprep.mubr.msk.f32.mxu1 %vm1573_vm5, %v1522_v60  ;;  %v3054_v36 = vsel %vm1346_vm1, 1.0, %v3771_v55 }
 0x122   : > { %v3511_v43 = vpop.f32.mrb[30].mxu1  ;;  %v883_v50 = vadd.f32 %v3463_v35, %v4108_v41  ;;  %v877_v29 = vpop.f32.mrb[31].mxu0  ;;  %3564 = vmatmul.mubr.msk.f32.gmra.mrb[58].mxu1 %vm1573_vm5, %v1523_v8  ;;  %v1525_v60 = vadd.f32 %v3041_v48, %v1075_v1  ;;  %v1078_v8 = vmax.f32 %v888_v31, 0.0  ;;  %v3044_v1 = vsel %vm1336_vm6, 1.0, %v3771_v55 }
 0x123   : > { %v4418_v45 = vadd.f32 %v3511_v43, %v4108_v41  ;;  %v1037_v25 = vpop.f32.mrb[31].mxu1  ;;  %v1524_v63 = vadd.f32 %v3040_v47, %v1074_v26  ;;  %v878_v39 = vadd.f32 %v4108_v41, %v877_v29  ;;  %v1079_v26 = vmax.f32 %v4114_v46, 0.0  ;;  %v4447_v35 = vpop.permute.xlu0 %1245 }
 0x124   : > { %v4426_v0 = vadd.f32 %v4108_v41, %v1037_v25  ;;  %v1077_v58 = vmax.f32 %v883_v50, 0.0  ;;  %v4439_v41 = vpop.permute.xlu1 %1242  ;;  %v1528_v7 = vadd.f32 %v3044_v1, %v1078_v8  ;;  %v1080_v47 = vmax.f32 %v4143_v4, 0.0 }
 0x125   : > { %v1076_v37 = vmax.f32 %v878_v39, 0.0  ;;  %3566 = vmatprep.mubr.msk.f32.mxu1 %vm1573_vm5, %v1524_v63  ;;  %v3046_v46 = vsel %vm1338_vm8, 1.0, %v3771_v55  ;;  %v1529_v50 = vadd.f32 %v3045_v53, %v1079_v26  ;;  %v1081_v29 = vmax.f32 %v4131_v62, 0.0 }
 0x126   : > { %3567 = vmatmul.mubr.msk.f32.gmra.mrb[60].mxu1 %vm1573_vm5, %v1525_v60  ;;  %v1527_v43 = vadd.f32 %v3043_v10, %v1077_v58  ;;  %v1530_v21 = vadd.f32 %v3046_v46, %v1080_v47  ;;  %v1082_v4 = vmax.f32 %v4167_v16, 0.0  ;;  %v3047_v63 = vsel %vm1339_vm9, 1.0, %v3771_v55 }
 0x127   : > { %v1526_v14 = vadd.f32 %v3042_v19, %v1076_v37  ;;  %v4465_v25 = vpop.permute.xlu0 %1251  ;;  %v1531_v62 = vadd.f32 %v3047_v63, %v1081_v29  ;;  %v1083_v39 = vmax.f32 %v4159_v38, 0.0  ;;  %v1084_v48 = vmax.f32 %v4185_v61, 0.0 }
 0x128   : > { %v4455_v31 = vpop.permute.xlu1 %1248  ;;  %v1532_v51 = vadd.f32 %v3048_v5, %v1082_v4  ;;  %v3049_v60 = vsel %vm1341_vm11, 1.0, %v3771_v55  ;;  %v1085_v37 = vmax.f32 %v4176_v57, 0.0  ;;  %v1086_v61 = vmax.f32 %v4203_v13, 0.0 }
 0x129   : > { %3569 = vmatprep.mubr.msk.f32.mxu1 %vm1573_vm5, %v1526_v14  ;;  %v1533_v58 = vadd.f32 %v3049_v60, %v1083_v39  ;;  %v1534_v3 = vadd.f32 %v3050_v22, %v1084_v48  ;;  %v3051_v19 = vsel %vm1343_vm13, 1.0, %v3771_v55  ;;  %v1087_v57 = vmax.f32 %v4194_v9, 0.0 }
 0x12a   : > { %3570 = vmatmul.mubr.msk.f32.gmra.mrb[62].mxu1 %vm1573_vm5, %v1527_v43  ;;  %v1535_v14 = vadd.f32 %v3051_v19, %v1085_v37  ;;  %v1536_v32 = vadd.f32 %v3052_v59, %v1086_v61  ;;  %v1088_v13 = vmax.f32 %v4221_v56, 0.0  ;;  %v3053_v1 = vsel %vm1345_vm15, 1.0, %v3771_v55 }
 0x12b   : > { %3572 = vmatprep.mubr.msk.f32.mxu1 %vm1573_vm5, %v1528_v7  ;;  %v1258_v38 = vpop.permute.xlu0 %1257  ;;  %vm1347_vm2 = vcmp.eq.s32.totalorder %v4103_v40, %v4439_v41  ;;  %v1537_v26 = vadd.f32 %v3053_v1, %v1087_v57  ;;  %v1089_v9 = vmax.f32 %v4212_v52, 0.0  ;;  %vm1348_vm3 = vcmp.eq.s32.totalorder %v4103_v40, %v4447_v35 }
 0x12c   : > { %v1255_v16 = vpop.permute.xlu1 %1254  ;;  %v1538_v56 = vadd.f32 %v3054_v36, %v1088_v13  ;;  %v1090_v43 = vmax.f32 %v4239_v11, 0.0  ;;  %v3055_v53 = vsel %vm1347_vm2, 1.0, %v3771_v55  ;;  %vm1349_vm4 = vcmp.eq.s32.totalorder %v4103_v40, %v4455_v31 }
 0x12d   : > { %v3056_v41 = vsel %vm1348_vm3, 1.0, %v3771_v55  ;;  %v1539_v52 = vadd.f32 %v3055_v53, %v1089_v9  ;;  %v1091_v47 = vmax.f32 %v4230_v6, 0.0  ;;  %vm1350_vm6 = vcmp.eq.s32.totalorder %v4103_v40, %v4465_v25 }
 0x12e   : > { %3573 = vmatmul.mubr.msk.f32.gmra.mrb[64].mxu1 %vm1573_vm5, %v1529_v50  ;;  %v1540_v35 = vadd.f32 %v3056_v41, %v1090_v43  ;;  %v1092_v11 = vmax.f32 %v4257_v17, 0.0  ;;  %v3057_v46 = vsel %vm1349_vm4, 1.0, %v3771_v55  ;;  %vm1351_vm7 = vcmp.eq.s32.totalorder %v4103_v40, %v1255_v16 }
 0x12f   : > { %3575 = vmatprep.mubr.msk.f32.mxu1 %vm1573_vm5, %v1530_v21  ;;  %v1264_v10 = vpop.permute.xlu0 %1263  ;;  %v3058_v31 = vsel %vm1350_vm6, 1.0, %v3771_v55  ;;  %v1541_v29 = vadd.f32 %v3057_v46, %v1091_v47  ;;  %v1093_v6 = vmax.f32 %v4248_v49, 0.0  ;;  %vm1352_vm8 = vcmp.eq.s32.totalorder %v4103_v40, %v1258_v38 }
 0x130   : > { %v1261_v8 = vpop.permute.xlu1 %1260  ;;  %v1542_v21 = vadd.f32 %v3058_v31, %v1092_v11  ;;  %v1094_v4 = vmax.f32 %v4275_v12, 0.0  ;;  %v3059_v25 = vsel %vm1351_vm7, 1.0, %v3771_v55  ;;  %v3060_v63 = vsel %vm1352_vm8, 1.0, %v3771_v55 }
 0x131   : > { %vm1353_vm9 = vcmp.eq.s32.totalorder %v4103_v40, %v1261_v8  ;;  %v1543_v5 = vadd.f32 %v3059_v25, %v1093_v6  ;;  %vm1354_vm10 = vcmp.eq.s32.totalorder %v4103_v40, %v1264_v10  ;;  %v1096_v12 = vmax.f32 %v4293_v28, 0.0 }
 0x132   : > { %3576 = vmatmul.mubr.msk.f32.gmra.mrb[66].mxu1 %vm1573_vm5, %v1531_v62  ;;  %v1095_v62 = vmax.f32 %v4266_v23, 0.0  ;;  %v1544_v39 = vadd.f32 %v3060_v63, %v1094_v4  ;;  %v3061_v16 = vsel %vm1353_vm9, 1.0, %v3771_v55  ;;  %v1097_v23 = vmax.f32 %v4284_v18, 0.0 }
 0x133   : > { %3578 = vmatprep.mubr.msk.f32.mxu1 %vm1573_vm5, %v1532_v51  ;;  %v1270_v7 = vpop.permute.xlu0 %1269  ;;  %v3062_v51 = vsel %vm1354_vm10, 1.0, %v3771_v55  ;;  %v1099_v61 = vmax.f32 %v4312_v15, 0.0  ;;  %v1100_v19 = vmax.f32 %v4338_v2, 0.0  ;;  %v1101_v57 = vmax.f32 %v4327_v24, 0.0 }
 0x134   : > { %v1267_v42 = vpop.permute.xlu1 %1266  ;;  %v1545_v60 = vadd.f32 %v3061_v16, %v1095_v62  ;;  %vm1356_vm12 = vcmp.eq.s32.totalorder %v4103_v40, %v1270_v7  ;;  %v1546_v22 = vadd.f32 %v3062_v51, %v1096_v12  ;;  %v1102_v2 = vmax.f32 %v4359_v54, 0.0 }
 0x135   : > { %vm1355_vm11 = vcmp.eq.s32.totalorder %v4103_v40, %v1267_v42  ;;  %v3064_v37 = vsel %vm1356_vm12, 1.0, %v3771_v55  ;;  %v1103_v24 = vmax.f32 %v4352_v34, 0.0  ;;  %v1104_v9 = vmax.f32 %v4380_v30, 0.0 }
 0x136   : > { %3579 = vmatmul.mubr.msk.f32.gmra.mrb[68].mxu1 %vm1573_vm5, %v1533_v58  ;;  %v1098_v58 = vmax.f32 %v4321_v44, 0.0  ;;  %v3063_v28 = vsel %vm1355_vm11, 1.0, %v3771_v55  ;;  %v1105_v53 = vmax.f32 %v4374_v33, 0.0  ;;  %v1106_v41 = vmax.f32 %v4401_v27, 0.0 }
 0x137   : > { %3581 = vmatprep.mubr.msk.f32.mxu1 %vm1573_vm5, %v1534_v3  ;;  %v1276_v17 = vpop.permute.xlu0 %1275  ;;  %v1547_v3 = vadd.f32 %v3063_v28, %v1097_v23  ;;  %v1108_v27 = vmax.f32 %v4426_v0, 0.0  ;;  %vm2226_vm10 = vcmask 261120  }
 0x138   : > { %v1273_v50 = vpop.permute.xlu1 %1272  ;;  %vm1358_vm14 = vcmp.eq.s32.totalorder %v4103_v40, %v1276_v17  ;;  %v1548_v18 = vadd.f32 %v3064_v37, %v1098_v58 }
 0x139   : > { %vm1357_vm13 = vcmp.eq.s32.totalorder %v4103_v40, %v1273_v50  ;;  %v3066_v59 = vsel %vm1358_vm14, 1.0, %v3771_v55 }
 0x13a   : > { %3582 = vmatmul.mubr.msk.f32.gmra.mrb[70].mxu1 %vm1573_vm5, %v1535_v14  ;;  %v3065_v8 = vsel %vm1357_vm13, 1.0, %v3771_v55 }
 0x13b   : > { %3584 = vmatprep.mubr.msk.f32.mxu1 %vm1573_vm5, %v1536_v32  ;;  %v1282_v48 = vpop.permute.xlu0 %1281  ;;  %v1549_v14 = vadd.f32 %v3065_v8, %v1099_v61  ;;  %v1550_v32 = vadd.f32 %v3066_v59, %v1100_v19 }
 0x13c   : > { %v1279_v49 = vpop.permute.xlu1 %1278  ;;  %vm1360_vm1 = vcmp.eq.s32.totalorder %v4103_v40, %v1282_v48 }
 0x13d   : > { %vm1359_vm15 = vcmp.eq.s32.totalorder %v4103_v40, %v1279_v49  ;;  %v3068_v10 = vsel %vm1360_vm1, 1.0, %v3771_v55 }
 0x13e   : > { %3585 = vmatmul.mubr.msk.f32.gmra.mrb[72].mxu1 %vm1573_vm5, %v1537_v26  ;;  %v3067_v13 = vsel %vm1359_vm15, 1.0, %v3771_v55  ;;  %v1552_v26 = vadd.f32 %v3068_v10, %v1102_v2 }
 0x13f   : > { %3587 = vmatprep.mubr.msk.f32.mxu1 %vm1573_vm5, %v1538_v56  ;;  %v1288_v44 = vpop.permute.xlu0 %1287  ;;  %v1551_v36 = vadd.f32 %v3067_v13, %v1101_v57 }
 0x140   : > { %v1285_v38 = vpop.permute.xlu1 %1284  ;;  %vm1362_vm3 = vcmp.eq.s32.totalorder %v4103_v40, %v1288_v44 }
 0x141   : > { %vm1361_vm2 = vcmp.eq.s32.totalorder %v4103_v40, %v1285_v38  ;;  %v3070_v56 = vsel %vm1362_vm3, 1.0, %v3771_v55 }
 0x142   : > { %3588 = vmatmul.mubr.msk.f32.gmra.mrb[74].mxu1 %vm1573_vm5, %v1539_v52  ;;  %v3069_v54 = vsel %vm1361_vm2, 1.0, %v3771_v55  ;;  %v1554_v34 = vadd.f32 %v3070_v56, %v1104_v9 }
 0x143   : > { %3590 = vmatprep.mubr.msk.f32.mxu1 %vm1573_vm5, %v1540_v35  ;;  %v1294_v1 = vpop.permute.xlu0 %1293  ;;  %v1553_v43 = vadd.f32 %v3069_v54, %v1103_v24  ;;  %v1107_v35 = vmax.f32 %v4395_v20, 0.0 }
 0x144   : > { %v1291_v15 = vpop.permute.xlu1 %1290  ;;  %vm1364_vm6 = vcmp.eq.s32.totalorder %v4103_v40, %v1294_v1 }
 0x145   : > { %vm1363_vm4 = vcmp.eq.s32.totalorder %v4103_v40, %v1291_v15  ;;  %v3072_v52 = vsel %vm1364_vm6, 1.0, %v3771_v55 }
 0x146   : > { %3591 = vmatmul.mubr.msk.f32.gmra.mrb[76].mxu1 %vm1573_vm5, %v1541_v29  ;;  %v3071_v7 = vsel %vm1363_vm4, 1.0, %v3771_v55  ;;  %v1556_v11 = vadd.f32 %v3072_v52, %v1106_v41  ;;  %v1109_v29 = vmax.f32 %v4418_v45, 0.0 }
 0x147   : > { %3593 = vmatprep.mubr.msk.f32.mxu1 %vm1573_vm5, %v1542_v21  ;;  %v1300_v30 = vpop.permute.xlu0 %1299  ;;  %v1555_v47 = vadd.f32 %v3071_v7, %v1105_v53  ;;  %v4594_v21 = vld [vmem:[%s4935_s5] ss:$0 sm:$0xff] }
 0x148   : > { %v1297_v42 = vpop.permute.xlu1 %1296  ;;  %vm1366_vm8 = vcmp.eq.s32.totalorder %v4103_v40, %v1300_v30 }
 0x149   : > { %vm1365_vm7 = vcmp.eq.s32.totalorder %v4103_v40, %v1297_v42  ;;  %v3074_v50 = vsel %vm1366_vm8, 1.0, %v3771_v55 }
 0x14a   : > { %3594 = vmatmul.mubr.msk.f32.gmra.mrb[78].mxu1 %vm1573_vm5, %v1543_v5  ;;  %v3073_v46 = vsel %vm1365_vm7, 1.0, %v3771_v55  ;;  %v1558_v20 = vadd.f32 %v3074_v50, %v1108_v27 }
 0x14b   : > { %3596 = vmatprep.mubr.msk.f32.mxu1 %vm1573_vm5, %v1544_v39  ;;  %v1557_v31 = vadd.f32 %v3073_v46, %v1107_v35 }
 0x14c   : > { %v1303_v33 = vpop.permute.xlu1 %1302 }
 0x14d   : > { %vm1367_vm9 = vcmp.eq.s32.totalorder %v4103_v40, %v1303_v33 }
 0x14e   : > { %3597 = vmatmul.mubr.msk.f32.gmra.mrb[80].mxu1 %vm1573_vm5, %v1545_v60  ;;  %v3075_v6 = vsel %vm1367_vm9, 1.0, %v3771_v55 }
 0x14f   : > { %3599 = vmatprep.mubr.msk.f32.mxu1 %vm1573_vm5, %v1546_v22  ;;  %v1559_v0 = vadd.f32 %v3075_v6, %v1109_v29 }
 0x152   : > { %3600 = vmatmul.mubr.msk.f32.gmra.mrb[82].mxu1 %vm1573_vm5, %v1547_v3 }
 0x153   : > { %3602 = vmatprep.mubr.msk.f32.mxu1 %vm1573_vm5, %v1548_v18 }
 0x156   : > { %3603 = vmatmul.mubr.msk.f32.gmra.mrb[84].mxu1 %vm1573_vm5, %v1549_v14 }
 0x157   : > { %3605 = vmatprep.mubr.msk.f32.mxu1 %vm1573_vm5, %v1550_v32 }
 0x15a   : > { %3606 = vmatmul.mubr.msk.f32.gmra.mrb[86].mxu1 %vm1573_vm5, %v1551_v36 }
 0x15b   : > { %3608 = vmatprep.mubr.msk.f32.mxu1 %vm1573_vm5, %v1552_v26 }
 0x15e   : > { %3609 = vmatmul.mubr.msk.f32.gmra.mrb[88].mxu1 %vm1573_vm5, %v1553_v43 }
 0x15f   : > { %3611 = vmatprep.mubr.msk.f32.mxu1 %vm1573_vm5, %v1554_v34 }
 0x162   : > { %3612 = vmatmul.mubr.msk.f32.gmra.mrb[90].mxu1 %vm1573_vm5, %v1555_v47 }
 0x163   : > { %3614 = vmatprep.mubr.msk.f32.mxu1 %vm1573_vm5, %v1556_v11 }
 0x166   : > { %3615 = vmatmul.mubr.msk.f32.gmra.mrb[92].mxu1 %vm1573_vm5, %v1557_v31 }
 0x167   : > { %3617 = vmatprep.mubr.msk.f32.mxu1 %vm1573_vm5, %v1558_v20 }
 0x16a   : > { %3618 = vmatmul.mubr.msk.f32.gmra.mrb[94].mxu1 %vm1573_vm5, %v1559_v0 }
 0x1c1   : > { %v3526_v40 = vpop.f32.mrb[32].mxu1 }
 0x1c2   : > { %v1838_v4 = vadd.f32 %v3526_v40, %v4594_v21  ;;  %v1832_v17 = vpop.f32.mrb[33].mxu1 }
 0x1c3   : > { %v1833_v45 = vadd.f32 %v4594_v21, %v1832_v17 }
 0x1c4   : > { %v2152_v63 = vmax.f32 %v1838_v4, 0.0 }
 0x1c5   : > { %v2151_v25 = vmax.f32 %v1833_v45, 0.0  ;;  %v3529_v55 = vpop.f32.mrb[34].mxu1 }
 0x1c6   : > { %v1848_v5 = vadd.f32 %v3529_v55, %v4594_v21  ;;  %v1842_v62 = vpop.f32.mrb[35].mxu1 }
 0x1c7   : > { %3628 = vmatprep.mubr.msk.f32.mxu0 %vm2226_vm10, %v2151_v25  ;;  %v1843_v49 = vadd.f32 %v4594_v21, %v1842_v62 }
 0x1c8   : > { %3629 = vmatmul.mubr.msk.f32.vlgmr.msra.gmra.mrb[32].mxu0 %vm2226_vm10, %v2152_v63  ;;  %v2154_v16 = vmax.f32 %v1848_v5, 0.0 }
 0x1c9   : > { %v2153_v39 = vmax.f32 %v1843_v49, 0.0  ;;  %v3532_v12 = vpop.f32.mrb[36].mxu1 }
 0x1ca   : > { %v1858_v51 = vadd.f32 %v3532_v12, %v4594_v21  ;;  %v1852_v48 = vpop.f32.mrb[37].mxu1 }
 0x1cb   : > { %v1853_v60 = vadd.f32 %v4594_v21, %v1852_v48  ;;  %3631 = vmatprep.mubr.msk.f32.mxu0 %vm2226_vm10, %v2153_v39 }
 0x1cc   : > { %3632 = vmatmul.mubr.msk.f32.gmra.mrb[34].mxu0 %vm2226_vm10, %v2154_v16  ;;  %v2156_v58 = vmax.f32 %v1858_v51, 0.0 }
 0x1cd   : > { %v2155_v23 = vmax.f32 %v1853_v60, 0.0  ;;  %v3535_v22 = vpop.f32.mrb[38].mxu1 }
 0x1ce   : > { %v1868_v28 = vadd.f32 %v3535_v22, %v4594_v21  ;;  %v1862_v38 = vpop.f32.mrb[39].mxu1 }
 0x1cf   : > { %v1863_v37 = vadd.f32 %v4594_v21, %v1862_v38  ;;  %3634 = vmatprep.mubr.msk.f32.mxu0 %vm2226_vm10, %v2155_v23 }
 0x1d0   : > { %3635 = vmatmul.mubr.msk.f32.gmra.mrb[36].mxu0 %vm2226_vm10, %v2156_v58  ;;  %v2158_v18 = vmax.f32 %v1868_v28, 0.0 }
 0x1d1   : > { %v2157_v3 = vmax.f32 %v1863_v37, 0.0  ;;  %v3538_v61 = vpop.f32.mrb[40].mxu1 }
 0x1d2   : > { %v1878_v19 = vadd.f32 %v3538_v61, %v4594_v21  ;;  %v1872_v44 = vpop.f32.mrb[41].mxu1 }
 0x1d3   : > { %v1873_v8 = vadd.f32 %v4594_v21, %v1872_v44  ;;  %3637 = vmatprep.mubr.msk.f32.mxu0 %vm2226_vm10, %v2157_v3 }
 0x1d4   : > { %3638 = vmatmul.mubr.msk.f32.gmra.mrb[38].mxu0 %vm2226_vm10, %v2158_v18  ;;  %v2160_v57 = vmax.f32 %v1878_v19, 0.0 }
 0x1d5   : > { %v2159_v59 = vmax.f32 %v1873_v8, 0.0  ;;  %v3541_v14 = vpop.f32.mrb[42].mxu1 }
 0x1d6   : > { %v1888_v15 = vadd.f32 %v3541_v14, %v4594_v21  ;;  %v1882_v32 = vpop.f32.mrb[43].mxu1 }
 0x1d7   : > { %v1883_v2 = vadd.f32 %v4594_v21, %v1882_v32  ;;  %3640 = vmatprep.mubr.msk.f32.mxu0 %vm2226_vm10, %v2159_v59 }
 0x1d8   : > { %3641 = vmatmul.mubr.msk.f32.gmra.mrb[40].mxu0 %vm2226_vm10, %v2160_v57  ;;  %v2162_v1 = vmax.f32 %v1888_v15, 0.0 }
 0x1d9   : > { %v2161_v13 = vmax.f32 %v1883_v2, 0.0  ;;  %v3544_v10 = vpop.f32.mrb[44].mxu1 }
 0x1da   : > { %v1898_v36 = vadd.f32 %v3544_v10, %v4594_v21  ;;  %v1892_v24 = vpop.f32.mrb[45].mxu1 }
 0x1db   : > { %v1893_v26 = vadd.f32 %v4594_v21, %v1892_v24  ;;  %3643 = vmatprep.mubr.msk.f32.mxu0 %vm2226_vm10, %v2161_v13 }
 0x1dc   : > { %3644 = vmatmul.mubr.msk.f32.gmra.mrb[42].mxu0 %vm2226_vm10, %v2162_v1  ;;  %v2164_v42 = vmax.f32 %v1898_v36, 0.0 }
 0x1dd   : > { %v2163_v9 = vmax.f32 %v1893_v26, 0.0  ;;  %v3547_v54 = vpop.f32.mrb[46].mxu1 }
 0x1de   : > { %v1908_v56 = vadd.f32 %v3547_v54, %v4594_v21  ;;  %v1902_v43 = vpop.f32.mrb[47].mxu1 }
 0x1df   : > { %v1903_v53 = vadd.f32 %v4594_v21, %v1902_v43  ;;  %3646 = vmatprep.mubr.msk.f32.mxu0 %vm2226_vm10, %v2163_v9 }
 0x1e0   : > { %3647 = vmatmul.mubr.msk.f32.gmra.mrb[44].mxu0 %vm2226_vm10, %v2164_v42  ;;  %v2166_v30 = vmax.f32 %v1908_v56, 0.0 }
 0x1e1   : > { %v2165_v34 = vmax.f32 %v1903_v53, 0.0  ;;  %v3550_v41 = vpop.f32.mrb[48].mxu1 }
 0x1e2   : > { %v1918_v7 = vadd.f32 %v3550_v41, %v4594_v21  ;;  %v1912_v52 = vpop.f32.mrb[49].mxu1 }
 0x1e3   : > { %v1913_v47 = vadd.f32 %v4594_v21, %v1912_v52  ;;  %3649 = vmatprep.mubr.msk.f32.mxu0 %vm2226_vm10, %v2165_v34 }
 0x1e4   : > { %3650 = vmatmul.mubr.msk.f32.gmra.mrb[46].mxu0 %vm2226_vm10, %v2166_v30  ;;  %v2168_v11 = vmax.f32 %v1918_v7, 0.0 }
 0x1e5   : > { %v2167_v35 = vmax.f32 %v1913_v47, 0.0  ;;  %v3553_v33 = vpop.f32.mrb[50].mxu1 }
 0x1e6   : > { %v1928_v27 = vadd.f32 %v3553_v33, %v4594_v21  ;;  %v1922_v46 = vpop.f32.mrb[51].mxu1 }
 0x1e7   : > { %v1923_v50 = vadd.f32 %v4594_v21, %v1922_v46  ;;  %3652 = vmatprep.mubr.msk.f32.mxu0 %vm2226_vm10, %v2167_v35 }
 0x1e8   : > { %3653 = vmatmul.mubr.msk.f32.gmra.mrb[48].mxu0 %vm2226_vm10, %v2168_v11  ;;  %v2170_v20 = vmax.f32 %v1928_v27, 0.0 }
 0x1e9   : > { %v2169_v31 = vmax.f32 %v1923_v50, 0.0  ;;  %v3556_v29 = vpop.f32.mrb[52].mxu1 }
 0x1ea   : > { %v1938_v6 = vadd.f32 %v3556_v29, %v4594_v21  ;;  %v1932_v0 = vpop.f32.mrb[53].mxu1 }
 0x1eb   : > { %v1933_v40 = vadd.f32 %v4594_v21, %v1932_v0  ;;  %3655 = vmatprep.mubr.msk.f32.mxu0 %vm2226_vm10, %v2169_v31 }
 0x1ec   : > { %3656 = vmatmul.mubr.msk.f32.gmra.mrb[50].mxu0 %vm2226_vm10, %v2170_v20  ;;  %v2172_v45 = vmax.f32 %v1938_v6, 0.0 }
 0x1ed   : > { %v2171_v4 = vmax.f32 %v1933_v40, 0.0  ;;  %v3559_v17 = vpop.f32.mrb[54].mxu1 }
 0x1ee   : > { %v1948_v25 = vadd.f32 %v3559_v17, %v4594_v21  ;;  %v1942_v63 = vpop.f32.mrb[55].mxu1 }
 0x1ef   : > { %v1943_v55 = vadd.f32 %v4594_v21, %v1942_v63  ;;  %3658 = vmatprep.mubr.msk.f32.mxu0 %vm2226_vm10, %v2171_v4 }
 0x1f0   : > { %3659 = vmatmul.mubr.msk.f32.gmra.mrb[52].mxu0 %vm2226_vm10, %v2172_v45  ;;  %v2174_v49 = vmax.f32 %v1948_v25, 0.0 }
 0x1f1   : > { %v2173_v5 = vmax.f32 %v1943_v55, 0.0  ;;  %v3562_v62 = vpop.f32.mrb[56].mxu1 }
 0x1f2   : > { %v1958_v39 = vadd.f32 %v3562_v62, %v4594_v21  ;;  %v1952_v12 = vpop.f32.mrb[57].mxu1 }
 0x1f3   : > { %v1953_v16 = vadd.f32 %v4594_v21, %v1952_v12  ;;  %3661 = vmatprep.mubr.msk.f32.mxu0 %vm2226_vm10, %v2173_v5 }
 0x1f4   : > { %3662 = vmatmul.mubr.msk.f32.gmra.mrb[54].mxu0 %vm2226_vm10, %v2174_v49  ;;  %v2176_v60 = vmax.f32 %v1958_v39, 0.0 }
 0x1f5   : > { %v2175_v51 = vmax.f32 %v1953_v16, 0.0  ;;  %v3565_v48 = vpop.f32.mrb[58].mxu1 }
 0x1f6   : > { %v1968_v23 = vadd.f32 %v3565_v48, %v4594_v21  ;;  %v1962_v22 = vpop.f32.mrb[59].mxu1 }
 0x1f7   : > { %v1963_v58 = vadd.f32 %v4594_v21, %v1962_v22  ;;  %3664 = vmatprep.mubr.msk.f32.mxu0 %vm2226_vm10, %v2175_v51 }
 0x1f8   : > { %3665 = vmatmul.mubr.msk.f32.gmra.mrb[56].mxu0 %vm2226_vm10, %v2176_v60  ;;  %v2178_v37 = vmax.f32 %v1968_v23, 0.0 }
 0x1f9   : > { %v2177_v28 = vmax.f32 %v1963_v58, 0.0  ;;  %v3568_v38 = vpop.f32.mrb[60].mxu1 }
 0x1fa   : > { %v1978_v3 = vadd.f32 %v3568_v38, %v4594_v21  ;;  %v1972_v61 = vpop.f32.mrb[61].mxu1 }
 0x1fb   : > { %v1973_v18 = vadd.f32 %v4594_v21, %v1972_v61  ;;  %3667 = vmatprep.mubr.msk.f32.mxu0 %vm2226_vm10, %v2177_v28 }
 0x1fc   : > { %3668 = vmatmul.mubr.msk.f32.gmra.mrb[58].mxu0 %vm2226_vm10, %v2178_v37  ;;  %v2180_v8 = vmax.f32 %v1978_v3, 0.0 }
 0x1fd   : > { %v2179_v19 = vmax.f32 %v1973_v18, 0.0  ;;  %v3571_v44 = vpop.f32.mrb[62].mxu1 }
 0x1fe   : > { %v1988_v59 = vadd.f32 %v3571_v44, %v4594_v21  ;;  %v1982_v14 = vpop.f32.mrb[63].mxu1 }
 0x1ff   : > { %v1983_v57 = vadd.f32 %v4594_v21, %v1982_v14  ;;  %3670 = vmatprep.mubr.msk.f32.mxu0 %vm2226_vm10, %v2179_v19 }
 0x200   : > { %3671 = vmatmul.mubr.msk.f32.gmra.mrb[60].mxu0 %vm2226_vm10, %v2180_v8  ;;  %v2182_v2 = vmax.f32 %v1988_v59, 0.0 }
 0x201   : > { %v2181_v15 = vmax.f32 %v1983_v57, 0.0  ;;  %v3574_v32 = vpop.f32.mrb[64].mxu1 }
 0x202   : > { %v1998_v13 = vadd.f32 %v3574_v32, %v4594_v21  ;;  %v1992_v10 = vpop.f32.mrb[65].mxu1 }
 0x203   : > { %v1993_v1 = vadd.f32 %v4594_v21, %v1992_v10  ;;  %3673 = vmatprep.mubr.msk.f32.mxu0 %vm2226_vm10, %v2181_v15 }
 0x204   : > { %3674 = vmatmul.mubr.msk.f32.gmra.mrb[62].mxu0 %vm2226_vm10, %v2182_v2  ;;  %v2184_v26 = vmax.f32 %v1998_v13, 0.0 }
 0x205   : > { %v2183_v36 = vmax.f32 %v1993_v1, 0.0  ;;  %v3577_v24 = vpop.f32.mrb[66].mxu1 }
 0x206   : > { %v2008_v9 = vadd.f32 %v3577_v24, %v4594_v21  ;;  %v2002_v54 = vpop.f32.mrb[67].mxu1 }
 0x207   : > { %v2003_v42 = vadd.f32 %v4594_v21, %v2002_v54  ;;  %3676 = vmatprep.mubr.msk.f32.mxu0 %vm2226_vm10, %v2183_v36 }
 0x208   : > { %3677 = vmatmul.mubr.msk.f32.gmra.mrb[64].mxu0 %vm2226_vm10, %v2184_v26  ;;  %v2186_v53 = vmax.f32 %v2008_v9, 0.0 }
 0x209   : > { %v2185_v56 = vmax.f32 %v2003_v42, 0.0  ;;  %v3580_v43 = vpop.f32.mrb[68].mxu1 }
 0x20a   : > { %v2018_v34 = vadd.f32 %v3580_v43, %v4594_v21  ;;  %v2012_v41 = vpop.f32.mrb[69].mxu1 }
 0x20b   : > { %v2013_v30 = vadd.f32 %v4594_v21, %v2012_v41  ;;  %3679 = vmatprep.mubr.msk.f32.mxu0 %vm2226_vm10, %v2185_v56 }
 0x20c   : > { %3680 = vmatmul.mubr.msk.f32.gmra.mrb[66].mxu0 %vm2226_vm10, %v2186_v53  ;;  %v2188_v47 = vmax.f32 %v2018_v34, 0.0 }
 0x20d   : > { %v2187_v7 = vmax.f32 %v2013_v30, 0.0  ;;  %v3583_v52 = vpop.f32.mrb[70].mxu1 }
 0x20e   : > { %v2028_v35 = vadd.f32 %v3583_v52, %v4594_v21  ;;  %v2022_v33 = vpop.f32.mrb[71].mxu1 }
 0x20f   : > { %v2023_v11 = vadd.f32 %v4594_v21, %v2022_v33  ;;  %3682 = vmatprep.mubr.msk.f32.mxu0 %vm2226_vm10, %v2187_v7 }
 0x210   : > { %3683 = vmatmul.mubr.msk.f32.gmra.mrb[68].mxu0 %vm2226_vm10, %v2188_v47  ;;  %v2190_v50 = vmax.f32 %v2028_v35, 0.0 }
 0x211   : > { %v2189_v27 = vmax.f32 %v2023_v11, 0.0  ;;  %v3586_v46 = vpop.f32.mrb[72].mxu1 }
 0x212   : > { %v2038_v31 = vadd.f32 %v3586_v46, %v4594_v21  ;;  %v2032_v29 = vpop.f32.mrb[73].mxu1 }
 0x213   : > { %v2033_v20 = vadd.f32 %v4594_v21, %v2032_v29  ;;  %3685 = vmatprep.mubr.msk.f32.mxu0 %vm2226_vm10, %v2189_v27 }
 0x214   : > { %3686 = vmatmul.mubr.msk.f32.gmra.mrb[70].mxu0 %vm2226_vm10, %v2190_v50  ;;  %v2192_v40 = vmax.f32 %v2038_v31, 0.0 }
 0x215   : > { %v2191_v6 = vmax.f32 %v2033_v20, 0.0  ;;  %v3589_v0 = vpop.f32.mrb[74].mxu1 }
 0x216   : > { %v2048_v4 = vadd.f32 %v3589_v0, %v4594_v21  ;;  %v2042_v17 = vpop.f32.mrb[75].mxu1 }
 0x217   : > { %v2043_v45 = vadd.f32 %v4594_v21, %v2042_v17  ;;  %3688 = vmatprep.mubr.msk.f32.mxu0 %vm2226_vm10, %v2191_v6 }
 0x218   : > { %3689 = vmatmul.mubr.msk.f32.gmra.mrb[72].mxu0 %vm2226_vm10, %v2192_v40  ;;  %v2194_v55 = vmax.f32 %v2048_v4, 0.0 }
 0x219   : > { %v2193_v25 = vmax.f32 %v2043_v45, 0.0  ;;  %v3592_v63 = vpop.f32.mrb[76].mxu1  ;;  %v4727_v45 = vld [vmem:[%s4937_s7] ss:$0 sm:$0xff] }
 0x21a   : > { %v2058_v5 = vadd.f32 %v3592_v63, %v4594_v21  ;;  %v2052_v62 = vpop.f32.mrb[77].mxu1 }
 0x21b   : > { %v2053_v49 = vadd.f32 %v4594_v21, %v2052_v62  ;;  %3691 = vmatprep.mubr.msk.f32.mxu0 %vm2226_vm10, %v2193_v25 }
 0x21c   : > { %3692 = vmatmul.mubr.msk.f32.gmra.mrb[74].mxu0 %vm2226_vm10, %v2194_v55  ;;  %v2196_v16 = vmax.f32 %v2058_v5, 0.0 }
 0x21d   : > { %v2195_v39 = vmax.f32 %v2053_v49, 0.0  ;;  %v3595_v12 = vpop.f32.mrb[78].mxu1 }
 0x21e   : > { %v2068_v51 = vadd.f32 %v3595_v12, %v4594_v21  ;;  %v2062_v48 = vpop.f32.mrb[79].mxu1 }
 0x21f   : > { %v2063_v60 = vadd.f32 %v4594_v21, %v2062_v48  ;;  %3694 = vmatprep.mubr.msk.f32.mxu0 %vm2226_vm10, %v2195_v39 }
 0x220   : > { %3695 = vmatmul.mubr.msk.f32.gmra.mrb[76].mxu0 %vm2226_vm10, %v2196_v16  ;;  %v2198_v58 = vmax.f32 %v2068_v51, 0.0 }
 0x221   : > { %v2197_v23 = vmax.f32 %v2063_v60, 0.0  ;;  %v3598_v22 = vpop.f32.mrb[80].mxu1 }
 0x222   : > { %v2078_v28 = vadd.f32 %v3598_v22, %v4594_v21  ;;  %v2072_v38 = vpop.f32.mrb[81].mxu1 }
 0x223   : > { %v2073_v37 = vadd.f32 %v4594_v21, %v2072_v38  ;;  %3697 = vmatprep.mubr.msk.f32.mxu0 %vm2226_vm10, %v2197_v23 }
 0x224   : > { %3698 = vmatmul.mubr.msk.f32.gmra.mrb[78].mxu0 %vm2226_vm10, %v2198_v58  ;;  %v2200_v18 = vmax.f32 %v2078_v28, 0.0 }
 0x225   : > { %v2199_v3 = vmax.f32 %v2073_v37, 0.0  ;;  %v3601_v61 = vpop.f32.mrb[82].mxu1 }
 0x226   : > { %v2088_v19 = vadd.f32 %v3601_v61, %v4594_v21  ;;  %v2082_v44 = vpop.f32.mrb[83].mxu1 }
 0x227   : > { %v2083_v8 = vadd.f32 %v4594_v21, %v2082_v44  ;;  %3700 = vmatprep.mubr.msk.f32.mxu0 %vm2226_vm10, %v2199_v3 }
 0x228   : > { %3701 = vmatmul.mubr.msk.f32.gmra.mrb[80].mxu0 %vm2226_vm10, %v2200_v18  ;;  %v2202_v57 = vmax.f32 %v2088_v19, 0.0 }
 0x229   : > { %v2201_v59 = vmax.f32 %v2083_v8, 0.0  ;;  %v3604_v14 = vpop.f32.mrb[84].mxu1 }
 0x22a   : > { %v2098_v15 = vadd.f32 %v3604_v14, %v4594_v21  ;;  %v2092_v32 = vpop.f32.mrb[85].mxu1 }
 0x22b   : > { %v2093_v2 = vadd.f32 %v4594_v21, %v2092_v32  ;;  %3703 = vmatprep.mubr.msk.f32.mxu0 %vm2226_vm10, %v2201_v59 }
 0x22c   : > { %3704 = vmatmul.mubr.msk.f32.gmra.mrb[82].mxu0 %vm2226_vm10, %v2202_v57  ;;  %v2204_v1 = vmax.f32 %v2098_v15, 0.0 }
 0x22d   : > { %v2203_v13 = vmax.f32 %v2093_v2, 0.0  ;;  %v3607_v10 = vpop.f32.mrb[86].mxu1 }
 0x22e   : > { %v2108_v36 = vadd.f32 %v3607_v10, %v4594_v21  ;;  %v2102_v24 = vpop.f32.mrb[87].mxu1 }
 0x22f   : > { %v2103_v26 = vadd.f32 %v4594_v21, %v2102_v24  ;;  %3706 = vmatprep.mubr.msk.f32.mxu0 %vm2226_vm10, %v2203_v13 }
 0x230   : > { %3707 = vmatmul.mubr.msk.f32.gmra.mrb[84].mxu0 %vm2226_vm10, %v2204_v1  ;;  %v2206_v42 = vmax.f32 %v2108_v36, 0.0 }
 0x231   : > { %v2205_v9 = vmax.f32 %v2103_v26, 0.0  ;;  %v3610_v54 = vpop.f32.mrb[88].mxu1 }
 0x232   : > { %v2118_v56 = vadd.f32 %v3610_v54, %v4594_v21  ;;  %v2112_v43 = vpop.f32.mrb[89].mxu1 }
 0x233   : > { %v2113_v53 = vadd.f32 %v4594_v21, %v2112_v43  ;;  %3709 = vmatprep.mubr.msk.f32.mxu0 %vm2226_vm10, %v2205_v9 }
 0x234   : > { %3710 = vmatmul.mubr.msk.f32.gmra.mrb[86].mxu0 %vm2226_vm10, %v2206_v42  ;;  %v2208_v30 = vmax.f32 %v2118_v56, 0.0 }
 0x235   : > { %v2207_v34 = vmax.f32 %v2113_v53, 0.0  ;;  %v3613_v41 = vpop.f32.mrb[90].mxu1 }
 0x236   : > { %v2128_v7 = vadd.f32 %v3613_v41, %v4594_v21  ;;  %v2122_v52 = vpop.f32.mrb[91].mxu1 }
 0x237   : > { %v2123_v47 = vadd.f32 %v4594_v21, %v2122_v52  ;;  %3712 = vmatprep.mubr.msk.f32.mxu0 %vm2226_vm10, %v2207_v34 }
 0x238   : > { %3713 = vmatmul.mubr.msk.f32.gmra.mrb[88].mxu0 %vm2226_vm10, %v2208_v30  ;;  %v2210_v11 = vmax.f32 %v2128_v7, 0.0 }
 0x239   : > { %v2209_v35 = vmax.f32 %v2123_v47, 0.0  ;;  %v3616_v33 = vpop.f32.mrb[92].mxu1 }
 0x23a   : > { %v2138_v27 = vadd.f32 %v3616_v33, %v4594_v21  ;;  %v2132_v46 = vpop.f32.mrb[93].mxu1 }
 0x23b   : > { %v2133_v50 = vadd.f32 %v4594_v21, %v2132_v46  ;;  %3715 = vmatprep.mubr.msk.f32.mxu0 %vm2226_vm10, %v2209_v35 }
 0x23c   : > { %3716 = vmatmul.mubr.msk.f32.gmra.mrb[90].mxu0 %vm2226_vm10, %v2210_v11  ;;  %v2212_v20 = vmax.f32 %v2138_v27, 0.0 }
 0x23d   : > { %v2211_v31 = vmax.f32 %v2133_v50, 0.0  ;;  %v3619_v29 = vpop.f32.mrb[94].mxu1 }
 0x23e   : > { %v2148_v6 = vadd.f32 %v3619_v29, %v4594_v21  ;;  %v2142_v0 = vpop.f32.mrb[95].mxu1 }
 0x23f   : > { %v2143_v40 = vadd.f32 %v4594_v21, %v2142_v0  ;;  %3718 = vmatprep.mubr.msk.f32.mxu0 %vm2226_vm10, %v2211_v31 }
 0x240   : > { %3719 = vmatmul.mubr.msk.f32.gmra.mrb[92].mxu0 %vm2226_vm10, %v2212_v20  ;;  %v2214_v17 = vmax.f32 %v2148_v6, 0.0 }
 0x241   : > { %v2213_v4 = vmax.f32 %v2143_v40, 0.0 }
 0x243   : > { %3721 = vmatprep.mubr.msk.f32.mxu0 %vm2226_vm10, %v2213_v4 }
 0x244   : > { %3722 = vmatmul.mubr.msk.f32.gmra.mrb[94].mxu0 %vm2226_vm10, %v2214_v17 }
 0x29b   : > { %v3630_v21 = vpop.f32.mrb[32].mxu0 }
 0x29c   : > { %v2491_v25 = vadd.f32 %v3630_v21, %v4727_v45  ;;  %v2485_v63 = vpop.f32.mrb[33].mxu0 }
 0x29d   : > { %v2486_v55 = vadd.f32 %v4727_v45, %v2485_v63 }
 0x29e   : > { %2805 = vst.msk [vmem:[%s4733_s28 + $0x8] sm:$0xff] %vm468_vm0, %v2491_v25 }
 0x29f   : > { %2804 = vst.msk [vmem:[%s4733_s28] sm:$0xff] %vm468_vm0, %v2486_v55  ;;  %v3633_v5 = vpop.f32.mrb[34].mxu0 }
 0x2a0   : > { %v2501_v62 = vadd.f32 %v3633_v5, %v4727_v45  ;;  %v2495_v49 = vpop.f32.mrb[35].mxu0 }
 0x2a1   : > { %v2496_v39 = vadd.f32 %v4727_v45, %v2495_v49 }
 0x2a2   : > { %2807 = vst.msk [vmem:[%s4733_s28 + $0x18] sm:$0xff] %vm468_vm0, %v2501_v62 }
 0x2a3   : > { %2806 = vst.msk [vmem:[%s4733_s28 + $0x10] sm:$0xff] %vm468_vm0, %v2496_v39  ;;  %v3636_v12 = vpop.f32.mrb[36].mxu0 }
 0x2a4   : > { %v2511_v16 = vadd.f32 %v3636_v12, %v4727_v45  ;;  %v2505_v51 = vpop.f32.mrb[37].mxu0 }
 0x2a5   : > { %v2506_v48 = vadd.f32 %v4727_v45, %v2505_v51 }
 0x2a6   : > { %2809 = vst.msk [vmem:[%s4733_s28 + $0x28] sm:$0xff] %vm468_vm0, %v2511_v16 }
 0x2a7   : > { %2808 = vst.msk [vmem:[%s4733_s28 + $0x20] sm:$0xff] %vm468_vm0, %v2506_v48  ;;  %v3639_v60 = vpop.f32.mrb[38].mxu0 }
 0x2a8   : > { %v2521_v23 = vadd.f32 %v3639_v60, %v4727_v45  ;;  %v2515_v22 = vpop.f32.mrb[39].mxu0 }
 0x2a9   : > { %v2516_v58 = vadd.f32 %v4727_v45, %v2515_v22 }
 0x2aa   : > { %2811 = vst.msk [vmem:[%s4733_s28 + $0x38] sm:$0xff] %vm468_vm0, %v2521_v23 }
 0x2ab   : > { %2810 = vst.msk [vmem:[%s4733_s28 + $0x30] sm:$0xff] %vm468_vm0, %v2516_v58  ;;  %v3642_v28 = vpop.f32.mrb[40].mxu0 }
 0x2ac   : > { %v2531_v38 = vadd.f32 %v3642_v28, %v4727_v45  ;;  %v2525_v37 = vpop.f32.mrb[41].mxu0 }
 0x2ad   : > { %v2526_v3 = vadd.f32 %v4727_v45, %v2525_v37 }
 0x2ae   : > { %2813 = vst.msk [vmem:[%s4733_s28 + $0x48] sm:$0xff] %vm468_vm0, %v2531_v38 }
 0x2af   : > { %2812 = vst.msk [vmem:[%s4733_s28 + $0x40] sm:$0xff] %vm468_vm0, %v2526_v3  ;;  %v3645_v61 = vpop.f32.mrb[42].mxu0 }
 0x2b0   : > { %v2541_v18 = vadd.f32 %v3645_v61, %v4727_v45  ;;  %v2535_v19 = vpop.f32.mrb[43].mxu0 }
 0x2b1   : > { %v2536_v44 = vadd.f32 %v4727_v45, %v2535_v19 }
 0x2b2   : > { %2815 = vst.msk [vmem:[%s4733_s28 + $0x58] sm:$0xff] %vm468_vm0, %v2541_v18 }
 0x2b3   : > { %2814 = vst.msk [vmem:[%s4733_s28 + $0x50] sm:$0xff] %vm468_vm0, %v2536_v44  ;;  %v3648_v8 = vpop.f32.mrb[44].mxu0 }
 0x2b4   : > { %v2551_v59 = vadd.f32 %v3648_v8, %v4727_v45  ;;  %v2545_v14 = vpop.f32.mrb[45].mxu0 }
 0x2b5   : > { %v2546_v57 = vadd.f32 %v4727_v45, %v2545_v14 }
 0x2b6   : > { %2817 = vst.msk [vmem:[%s4733_s28 + $0x68] sm:$0xff] %vm468_vm0, %v2551_v59 }
 0x2b7   : > { %2816 = vst.msk [vmem:[%s4733_s28 + $0x60] sm:$0xff] %vm468_vm0, %v2546_v57  ;;  %v3651_v15 = vpop.f32.mrb[46].mxu0 }
 0x2b8   : > { %v2561_v32 = vadd.f32 %v3651_v15, %v4727_v45  ;;  %v2555_v2 = vpop.f32.mrb[47].mxu0 }
 0x2b9   : > { %v2556_v13 = vadd.f32 %v4727_v45, %v2555_v2 }
 0x2ba   : > { %2819 = vst.msk [vmem:[%s4733_s28 + $0x78] sm:$0xff] %vm468_vm0, %v2561_v32 }
 0x2bb   : > { %2818 = vst.msk [vmem:[%s4733_s28 + $0x70] sm:$0xff] %vm468_vm0, %v2556_v13  ;;  %v3654_v10 = vpop.f32.mrb[48].mxu0 }
 0x2bc   : > { %v2571_v1 = vadd.f32 %v3654_v10, %v4727_v45  ;;  %v2565_v36 = vpop.f32.mrb[49].mxu0 }
 0x2bd   : > { %v2566_v24 = vadd.f32 %v4727_v45, %v2565_v36 }
 0x2be   : > { %2821 = vst.msk [vmem:[%s4733_s28 + $0x88] sm:$0xff] %vm468_vm0, %v2571_v1 }
 0x2bf   : > { %2820 = vst.msk [vmem:[%s4733_s28 + $0x80] sm:$0xff] %vm468_vm0, %v2566_v24  ;;  %v3657_v26 = vpop.f32.mrb[50].mxu0 }
 0x2c0   : > { %v2581_v9 = vadd.f32 %v3657_v26, %v4727_v45  ;;  %v2575_v54 = vpop.f32.mrb[51].mxu0 }
 0x2c1   : > { %v2576_v42 = vadd.f32 %v4727_v45, %v2575_v54 }
 0x2c2   : > { %2823 = vst.msk [vmem:[%s4733_s28 + $0x98] sm:$0xff] %vm468_vm0, %v2581_v9 }
 0x2c3   : > { %2822 = vst.msk [vmem:[%s4733_s28 + $0x90] sm:$0xff] %vm468_vm0, %v2576_v42  ;;  %v3660_v56 = vpop.f32.mrb[52].mxu0 }
 0x2c4   : > { %v2591_v43 = vadd.f32 %v3660_v56, %v4727_v45  ;;  %v2585_v53 = vpop.f32.mrb[53].mxu0 }
 0x2c5   : > { %v2586_v34 = vadd.f32 %v4727_v45, %v2585_v53 }
 0x2c6   : > { %2825 = vst.msk [vmem:[%s4733_s28 + $0xa8] sm:$0xff] %vm468_vm0, %v2591_v43 }
 0x2c7   : > { %2824 = vst.msk [vmem:[%s4733_s28 + $0xa0] sm:$0xff] %vm468_vm0, %v2586_v34  ;;  %v3663_v41 = vpop.f32.mrb[54].mxu0 }
 0x2c8   : > { %v2601_v30 = vadd.f32 %v3663_v41, %v4727_v45  ;;  %v2595_v7 = vpop.f32.mrb[55].mxu0 }
 0x2c9   : > { %v2596_v52 = vadd.f32 %v4727_v45, %v2595_v7 }
 0x2ca   : > { %2827 = vst.msk [vmem:[%s4733_s28 + $0xb8] sm:$0xff] %vm468_vm0, %v2601_v30 }
 0x2cb   : > { %2826 = vst.msk [vmem:[%s4733_s28 + $0xb0] sm:$0xff] %vm468_vm0, %v2596_v52  ;;  %v3666_v47 = vpop.f32.mrb[56].mxu0 }
 0x2cc   : > { %v2611_v35 = vadd.f32 %v3666_v47, %v4727_v45  ;;  %v2605_v33 = vpop.f32.mrb[57].mxu0 }
 0x2cd   : > { %v2606_v11 = vadd.f32 %v4727_v45, %v2605_v33 }
 0x2ce   : > { %2829 = vst.msk [vmem:[%s4733_s28 + $0xc8] sm:$0xff] %vm468_vm0, %v2611_v35 }
 0x2cf   : > { %2828 = vst.msk [vmem:[%s4733_s28 + $0xc0] sm:$0xff] %vm468_vm0, %v2606_v11  ;;  %v3669_v27 = vpop.f32.mrb[58].mxu0 }
 0x2d0   : > { %v2621_v46 = vadd.f32 %v3669_v27, %v4727_v45  ;;  %v2615_v50 = vpop.f32.mrb[59].mxu0 }
 0x2d1   : > { %v2616_v31 = vadd.f32 %v4727_v45, %v2615_v50 }
 0x2d2   : > { %2831 = vst.msk [vmem:[%s4733_s28 + $0xd8] sm:$0xff] %vm468_vm0, %v2621_v46 }
 0x2d3   : > { %2830 = vst.msk [vmem:[%s4733_s28 + $0xd0] sm:$0xff] %vm468_vm0, %v2616_v31  ;;  %v3672_v29 = vpop.f32.mrb[60].mxu0 }
 0x2d4   : > { %v2631_v20 = vadd.f32 %v3672_v29, %v4727_v45  ;;  %v2625_v6 = vpop.f32.mrb[61].mxu0 }
 0x2d5   : > { %v2626_v0 = vadd.f32 %v4727_v45, %v2625_v6 }
 0x2d6   : > { %2833 = vst.msk [vmem:[%s4733_s28 + $0xe8] sm:$0xff] %vm468_vm0, %v2631_v20 }
 0x2d7   : > { %2832 = vst.msk [vmem:[%s4733_s28 + $0xe0] sm:$0xff] %vm468_vm0, %v2626_v0  ;;  %v3675_v40 = vpop.f32.mrb[62].mxu0 }
 0x2d8   : > { %v2641_v4 = vadd.f32 %v3675_v40, %v4727_v45  ;;  %v2635_v17 = vpop.f32.mrb[63].mxu0 }
 0x2d9   : > { %v2636_v21 = vadd.f32 %v4727_v45, %v2635_v17 }
 0x2da   : > { %2835 = vst.msk [vmem:[%s4733_s28 + $0xf8] sm:$0xff] %vm468_vm0, %v2641_v4 }
 0x2db   : > { %2834 = vst.msk [vmem:[%s4733_s28 + $0xf0] sm:$0xff] %vm468_vm0, %v2636_v21  ;;  %v3678_v25 = vpop.f32.mrb[64].mxu0 }
 0x2dc   : > { %v2651_v63 = vadd.f32 %v3678_v25, %v4727_v45  ;;  %v2645_v55 = vpop.f32.mrb[65].mxu0 }
 0x2dd   : > { %v2646_v5 = vadd.f32 %v4727_v45, %v2645_v55 }
 0x2de   : > { %2837 = vst.msk [vmem:[%s4733_s28 + $0x108] sm:$0xff] %vm468_vm0, %v2651_v63 }
 0x2df   : > { %2836 = vst.msk [vmem:[%s4733_s28 + $0x100] sm:$0xff] %vm468_vm0, %v2646_v5  ;;  %v3681_v62 = vpop.f32.mrb[66].mxu0 }
 0x2e0   : > { %v2661_v49 = vadd.f32 %v3681_v62, %v4727_v45  ;;  %v2655_v39 = vpop.f32.mrb[67].mxu0 }
 0x2e1   : > { %v2656_v12 = vadd.f32 %v4727_v45, %v2655_v39 }
 0x2e2   : > { %2839 = vst.msk [vmem:[%s4733_s28 + $0x118] sm:$0xff] %vm468_vm0, %v2661_v49 }
 0x2e3   : > { %2838 = vst.msk [vmem:[%s4733_s28 + $0x110] sm:$0xff] %vm468_vm0, %v2656_v12  ;;  %v3684_v16 = vpop.f32.mrb[68].mxu0 }
 0x2e4   : > { %v2671_v51 = vadd.f32 %v3684_v16, %v4727_v45  ;;  %v2665_v48 = vpop.f32.mrb[69].mxu0 }
 0x2e5   : > { %v2666_v60 = vadd.f32 %v4727_v45, %v2665_v48 }
 0x2e6   : > { %2841 = vst.msk [vmem:[%s4733_s28 + $0x128] sm:$0xff] %vm468_vm0, %v2671_v51 }
 0x2e7   : > { %2840 = vst.msk [vmem:[%s4733_s28 + $0x120] sm:$0xff] %vm468_vm0, %v2666_v60  ;;  %v3687_v23 = vpop.f32.mrb[70].mxu0 }
 0x2e8   : > { %v2681_v22 = vadd.f32 %v3687_v23, %v4727_v45  ;;  %v2675_v58 = vpop.f32.mrb[71].mxu0 }
 0x2e9   : > { %v2676_v28 = vadd.f32 %v4727_v45, %v2675_v58 }
 0x2ea   : > { %2843 = vst.msk [vmem:[%s4733_s28 + $0x138] sm:$0xff] %vm468_vm0, %v2681_v22 }
 0x2eb   : > { %2842 = vst.msk [vmem:[%s4733_s28 + $0x130] sm:$0xff] %vm468_vm0, %v2676_v28  ;;  %v3690_v38 = vpop.f32.mrb[72].mxu0 }
 0x2ec   : > { %v2691_v37 = vadd.f32 %v3690_v38, %v4727_v45  ;;  %v2685_v3 = vpop.f32.mrb[73].mxu0 }
 0x2ed   : > { %v2686_v61 = vadd.f32 %v4727_v45, %v2685_v3 }
 0x2ee   : > { %2845 = vst.msk [vmem:[%s4733_s28 + $0x148] sm:$0xff] %vm468_vm0, %v2691_v37 }
 0x2ef   : > { %2844 = vst.msk [vmem:[%s4733_s28 + $0x140] sm:$0xff] %vm468_vm0, %v2686_v61  ;;  %v3693_v18 = vpop.f32.mrb[74].mxu0 }
 0x2f0   : > { %v2701_v19 = vadd.f32 %v3693_v18, %v4727_v45  ;;  %v2695_v44 = vpop.f32.mrb[75].mxu0 }
 0x2f1   : > { %v2696_v8 = vadd.f32 %v4727_v45, %v2695_v44 }
 0x2f2   : > { %2847 = vst.msk [vmem:[%s4733_s28 + $0x158] sm:$0xff] %vm468_vm0, %v2701_v19 }
 0x2f3   : > { %2846 = vst.msk [vmem:[%s4733_s28 + $0x150] sm:$0xff] %vm468_vm0, %v2696_v8  ;;  %v3696_v59 = vpop.f32.mrb[76].mxu0 }
 0x2f4   : > { %v2711_v14 = vadd.f32 %v3696_v59, %v4727_v45  ;;  %v2705_v57 = vpop.f32.mrb[77].mxu0 }
 0x2f5   : > { %v2706_v15 = vadd.f32 %v4727_v45, %v2705_v57 }
 0x2f6   : > { %2849 = vst.msk [vmem:[%s4733_s28 + $0x168] sm:$0xff] %vm468_vm0, %v2711_v14 }
 0x2f7   : > { %2848 = vst.msk [vmem:[%s4733_s28 + $0x160] sm:$0xff] %vm468_vm0, %v2706_v15  ;;  %v3699_v32 = vpop.f32.mrb[78].mxu0 }
 0x2f8   : > { %v2721_v2 = vadd.f32 %v3699_v32, %v4727_v45  ;;  %v2715_v13 = vpop.f32.mrb[79].mxu0 }
 0x2f9   : > { %v2716_v10 = vadd.f32 %v4727_v45, %v2715_v13 }
 0x2fa   : > { %2851 = vst.msk [vmem:[%s4733_s28 + $0x178] sm:$0xff] %vm468_vm0, %v2721_v2 }
 0x2fb   : > { %2850 = vst.msk [vmem:[%s4733_s28 + $0x170] sm:$0xff] %vm468_vm0, %v2716_v10  ;;  %v3702_v1 = vpop.f32.mrb[80].mxu0 }
 0x2fc   : > { %v2731_v36 = vadd.f32 %v3702_v1, %v4727_v45  ;;  %v2725_v24 = vpop.f32.mrb[81].mxu0 }
 0x2fd   : > { %v2726_v26 = vadd.f32 %v4727_v45, %v2725_v24 }
 0x2fe   : > { %2853 = vst.msk [vmem:[%s4733_s28 + $0x188] sm:$0xff] %vm468_vm0, %v2731_v36 }
 0x2ff   : > { %2852 = vst.msk [vmem:[%s4733_s28 + $0x180] sm:$0xff] %vm468_vm0, %v2726_v26  ;;  %v3705_v9 = vpop.f32.mrb[82].mxu0 }
 0x300   : > { %v2741_v54 = vadd.f32 %v3705_v9, %v4727_v45  ;;  %v2735_v42 = vpop.f32.mrb[83].mxu0 }
 0x301   : > { %v2736_v56 = vadd.f32 %v4727_v45, %v2735_v42 }
 0x302   : > { %2855 = vst.msk [vmem:[%s4733_s28 + $0x198] sm:$0xff] %vm468_vm0, %v2741_v54 }
 0x303   : > { %2854 = vst.msk [vmem:[%s4733_s28 + $0x190] sm:$0xff] %vm468_vm0, %v2736_v56  ;;  %v3708_v43 = vpop.f32.mrb[84].mxu0 }
 0x304   : > { %v2751_v53 = vadd.f32 %v3708_v43, %v4727_v45  ;;  %v2745_v34 = vpop.f32.mrb[85].mxu0 }
 0x305   : > { %v2746_v41 = vadd.f32 %v4727_v45, %v2745_v34 }
 0x306   : > { %2857 = vst.msk [vmem:[%s4733_s28 + $0x1a8] sm:$0xff] %vm468_vm0, %v2751_v53 }
 0x307   : > { %2856 = vst.msk [vmem:[%s4733_s28 + $0x1a0] sm:$0xff] %vm468_vm0, %v2746_v41  ;;  %v3711_v30 = vpop.f32.mrb[86].mxu0 }
 0x308   : > { %v2761_v7 = vadd.f32 %v3711_v30, %v4727_v45  ;;  %v2755_v52 = vpop.f32.mrb[87].mxu0 }
 0x309   : > { %v2756_v47 = vadd.f32 %v4727_v45, %v2755_v52 }
 0x30a   : > { %2859 = vst.msk [vmem:[%s4733_s28 + $0x1b8] sm:$0xff] %vm468_vm0, %v2761_v7 }
 0x30b   : > { %2858 = vst.msk [vmem:[%s4733_s28 + $0x1b0] sm:$0xff] %vm468_vm0, %v2756_v47  ;;  %v3714_v35 = vpop.f32.mrb[88].mxu0 }
 0x30c   : > { %v2771_v33 = vadd.f32 %v3714_v35, %v4727_v45  ;;  %v2765_v11 = vpop.f32.mrb[89].mxu0 }
 0x30d   : > { %v2766_v27 = vadd.f32 %v4727_v45, %v2765_v11 }
 0x30e   : > { %2861 = vst.msk [vmem:[%s4733_s28 + $0x1c8] sm:$0xff] %vm468_vm0, %v2771_v33 }
 0x30f   : > { %2860 = vst.msk [vmem:[%s4733_s28 + $0x1c0] sm:$0xff] %vm468_vm0, %v2766_v27  ;;  %v3717_v46 = vpop.f32.mrb[90].mxu0 }
 0x310   : > { %v2781_v50 = vadd.f32 %v3717_v46, %v4727_v45  ;;  %v2775_v31 = vpop.f32.mrb[91].mxu0 }
 0x311   : > { %v2776_v29 = vadd.f32 %v4727_v45, %v2775_v31 }
 0x312   : > { %2863 = vst.msk [vmem:[%s4733_s28 + $0x1d8] sm:$0xff] %vm468_vm0, %v2781_v50 }
 0x313   : > { %2862 = vst.msk [vmem:[%s4733_s28 + $0x1d0] sm:$0xff] %vm468_vm0, %v2776_v29  ;;  %v3720_v20 = vpop.f32.mrb[92].mxu0 }
 0x314   : > { %v2791_v6 = vadd.f32 %v3720_v20, %v4727_v45  ;;  %v2785_v0 = vpop.f32.mrb[93].mxu0 }
 0x315   : > { %v2786_v40 = vadd.f32 %v4727_v45, %v2785_v0 }
 0x316   : > { %2865 = vst.msk [vmem:[%s4733_s28 + $0x1e8] sm:$0xff] %vm468_vm0, %v2791_v6 }
 0x317   : > { %2864 = vst.msk [vmem:[%s4733_s28 + $0x1e0] sm:$0xff] %vm468_vm0, %v2786_v40  ;;  %v3723_v4 = vpop.f32.mrb[94].mxu0 }
 0x318   : > { %v2801_v17 = vadd.f32 %v3723_v4, %v4727_v45  ;;  %v2795_v21 = vpop.f32.mrb[95].mxu0 }
 0x319   : > { %v2796_v25 = vadd.f32 %v4727_v45, %v2795_v21 }
 0x31a   : > { %2867 = vst.msk [vmem:[%s4733_s28 + $0x1f8] sm:$0xff] %vm468_vm0, %v2801_v17 }
 0x31b   : > { %2866 = vst.msk [vmem:[%s4733_s28 + $0x1f0] sm:$0xff] %vm468_vm0, %v2796_v25 }
 0x31c PF: > { %s18_s27 = sadd.s32 1, %s3768_s27  }
 0x31d   : > { %p15_p4 = scmp.ge.s32.totalorder %s18_s27, 4  }
 0x31f   :  { %17 = sbr.rel (!%p15_p4) target bundleno = 1 (0x1), region = 85 }

</bundles_post_ra>
